<compile_context>
chip_gen: v7x
topology: tpu7x:2x2x1
jax: 0.10.0
libtpu: 0.0.40
codegen_flags: <defaults>
</compile_context>

<pallas_src>
import functools
import math

import jax
import jax.numpy as jnp
from jax.experimental import pallas as pl
from jax.experimental.pallas import tpu as pltpu

# ----------------------- small ViT configuration ----------------------------
BATCH = 2
C, H, W = 3, 16, 16          # input image (NCHW)
P = 8                        # patch size (vit_b_32 analogue)
N_PATCH = (H // P) * (W // P)          # 4
SEQ = N_PATCH + 1                      # 5 (+ class token)
SEQ_PAD = 8                  # pad sequence to a full 8-sublane tile
HIDDEN = 32                  # embedding dim
NUM_HEADS = 4
HEAD_DIM = HIDDEN // NUM_HEADS         # 8
MLP_DIM = 64
NUM_LAYERS = 2
NUM_CLASSES = 3
LN_EPS = 1e-6                # torchvision ViT uses eps=1e-6
PATCH_FEAT = C * P * P                 # 192
HEAD_PAD = 128               # lane-dense padded head output width
TC_PARALLEL_STEPS = 2        # aim for >= 2 parallel grid steps (v7x has 2 TCs)


# ------------------------------ kernel helpers --------------------------------
def _gelu(x):
    # tanh approximation (exact erf lowering not guaranteed in Mosaic)
    c = math.sqrt(2.0 / math.pi)
    return 0.5 * x * (1.0 + jnp.tanh(c * (x + 0.044715 * x * x * x)))


def _layernorm(x, g, b):
    x = x.astype(jnp.float32)
    mean = jnp.mean(x, axis=-1, keepdims=True)
    var = jnp.mean(jnp.square(x - mean), axis=-1, keepdims=True)
    return (x - mean) * jax.lax.rsqrt(var + LN_EPS) * g + b


# ------------------------------ fused kernel ----------------------------------
def vit_fused_kernel(patches_ref, emb_w_ref, emb_add_ref, qkv_w_ref, qkv_b_ref,
                     out_w_ref, mlp_w1_ref, mlp_w2_ref, vec_ref, b1_ref,
                     lnf_ref, head_w_ref, head_b_ref, out_ref, *, bt):
    """One grid step == `bt` images processed as one stacked token slab."""
    rows = bt * SEQ_PAD

    # ---- patch embedding on the stacked token slab (fills matmul M) ---------
    # row 0 of every image slab is all-zero (class-token slot), rows SEQ.. are
    # zero sequence padding; class_token/conv_b/pos_emb are folded into emb_add.
    patches = patches_ref[...].reshape(rows, PATCH_FEAT)          # bf16
    x = jnp.dot(patches, emb_w_ref[...],
                preferred_element_type=jnp.float32) + emb_add_ref[...]   # (rows, E) f32

    # key-padding mask: large negative on padded key columns (SEQ..SEQ_PAD-1)
    kiota = jax.lax.broadcasted_iota(jnp.int32, (1, 1, SEQ_PAD), 2)
    kmask = jnp.where(kiota < SEQ, 0.0, -1e30)

    scale = 1.0 / math.sqrt(HEAD_DIM)
    dn_proj = (((2,), (1,)), ((0,), (0,)))   # (H,M,E) x (H,E,Dh) -> (H,M,Dh)
    dn_qkt = (((2,), (2,)), ((0,), (0,)))    # (H,S,Dh) x (H,S,Dh) -> (H,S,S)
    dn_pv = (((2,), (1,)), ((0,), (0,)))     # (H,S,S) x (H,S,Dh)  -> (H,S,Dh)

    for l in range(NUM_LAYERS):
        wqkv = qkv_w_ref[l]                  # (3H, E, Dh) bf16  head-major
        bqkv = qkv_b_ref[l]                  # (3H, Dh)   f32
        w_out = out_w_ref[l]                 # (E, E)     bf16
        w1 = mlp_w1_ref[l]                   # (E, MLP)   bf16
        w2 = mlp_w2_ref[l]                   # (MLP, E)   bf16
        vec = vec_ref[l]                     # (6, E)     f32
        ln1_g, ln1_b = vec[0:1], vec[1:2]
        b_out = vec[2:3]
        ln2_g, ln2_b = vec[3:4], vec[4:5]
        b2 = vec[5:6]
        b1 = b1_ref[l]                       # (1, MLP)   f32

        wq, wk, wv = (wqkv[0:NUM_HEADS],
                      wqkv[NUM_HEADS:2 * NUM_HEADS],
                      wqkv[2 * NUM_HEADS:3 * NUM_HEADS])
        bq, bk, bv = (bqkv[0:NUM_HEADS],
                      bqkv[NUM_HEADS:2 * NUM_HEADS],
                      bqkv[2 * NUM_HEADS:3 * NUM_HEADS])

        # ---------------- self-attention block --------------------------------
        y = _layernorm(x, ln1_g, ln1_b)                              # (rows, E) f32
        yb = jnp.broadcast_to(y.astype(jnp.bfloat16),
                              (NUM_HEADS, rows, HIDDEN))
        q = jax.lax.dot_general(yb, wq, dn_proj,
                                preferred_element_type=jnp.float32) + bq[:, None, :]
        k = jax.lax.dot_general(yb, wk, dn_proj,
                                preferred_element_type=jnp.float32) + bk[:, None, :]
        v = jax.lax.dot_general(yb, wv, dn_proj,
                                preferred_element_type=jnp.float32) + bv[:, None, :]

        per_image = []
        for i in range(bt):                      # small static loop over images
            sl = slice(i * SEQ_PAD, (i + 1) * SEQ_PAD)
            qi = q[:, sl, :].astype(jnp.bfloat16)
            ki = k[:, sl, :].astype(jnp.bfloat16)
            vi = v[:, sl, :].astype(jnp.bfloat16)
            s = jax.lax.dot_general(qi, ki, dn_qkt,
                                    preferred_element_type=jnp.float32) * scale
            s = s + kmask
            s = s - jnp.max(s, axis=-1, keepdims=True)
            p = jnp.exp(s)
            p = p * pl.reciprocal(jnp.sum(p, axis=-1, keepdims=True), approx=True)
            ai = jax.lax.dot_general(p.astype(jnp.bfloat16), vi, dn_pv,
                                     preferred_element_type=jnp.float32)  # (H,S,Dh)
            # merge heads with one full-width concat (no scratch stores)
            per_image.append(jnp.concatenate([ai[h] for h in range(NUM_HEADS)],
                                             axis=-1))                   # (S, E)
        attn = per_image[0] if bt == 1 else jnp.concatenate(per_image, axis=0)
        attn = jnp.dot(attn.astype(jnp.bfloat16), w_out,
                       preferred_element_type=jnp.float32) + b_out
        x = x + attn

        # ---------------- MLP block --------------------------------------------
        z = _layernorm(x, ln2_g, ln2_b)
        h1 = _gelu(jnp.dot(z.astype(jnp.bfloat16), w1,
                           preferred_element_type=jnp.float32) + b1)
        z2 = jnp.dot(h1.astype(jnp.bfloat16), w2,
                     preferred_element_type=jnp.float32) + b2
        x = x + z2

    # ---- final LN, class-token rows, lane-padded classification head ---------
    lnf = lnf_ref[...]
    x = _layernorm(x, lnf[0:1], lnf[1:2])
    if bt == 1:
        cls = x[0:1, :]
    else:
        cls = jnp.concatenate([x[i * SEQ_PAD:i * SEQ_PAD + 1, :] for i in range(bt)],
                              axis=0)                                     # (bt, E)
    logits = jnp.dot(cls.astype(jnp.bfloat16), head_w_ref[...],
                     preferred_element_type=jnp.float32) + head_b_ref[...]  # (bt, 128)
    out_ref[...] = logits[:, None, :].astype(out_ref.dtype)


# ------------------------------ parameters -----------------------------------
def init_params(key):
    keys = iter(jax.random.split(key, 6 + 8 * NUM_LAYERS))

    def nrm(shape, scale=0.02):
        return (scale * jax.random.normal(next(keys), shape)).astype(jnp.float32)

    # generate in PyTorch layouts, then pre-transform ONCE into kernel layouts
    conv_w = nrm((HIDDEN, C, P, P))            # Conv2d(C, HIDDEN, P, stride=P)
    conv_b = nrm((HIDDEN,))
    class_token = nrm((1, 1, HIDDEN))
    pos_emb = nrm((1, SEQ, HIDDEN))
    head_w_pt = nrm((NUM_CLASSES, HIDDEN))     # nn.Linear(in_features, num_classes)
    head_b_pt = nrm((NUM_CLASSES,))

    # patch-embed weight in (K, N) MXU layout, bf16
    emb_w = conv_w.reshape(HIDDEN, PATCH_FEAT).T.astype(jnp.bfloat16)
    # fold class_token / conv bias / positional embedding into one additive slab
    emb_add = jnp.zeros((SEQ_PAD, HIDDEN), jnp.float32)
    emb_add = emb_add.at[0].set(class_token[0, 0] + pos_emb[0, 0])
    emb_add = emb_add.at[1:SEQ].set(conv_b[None, :] + pos_emb[0, 1:SEQ])

    def head_major(w_t):                       # (E, E) = W.T  ->  (H, E, Dh)
        return w_t.reshape(HIDDEN, NUM_HEADS, HEAD_DIM).transpose(1, 0, 2)

    ones = jnp.ones((HIDDEN,), jnp.float32)
    zeros = jnp.zeros((HIDDEN,), jnp.float32)

    qkv_w_l, qkv_b_l, out_w_l, w1_l, w2_l, vec_l, b1_l = [], [], [], [], [], [], []
    for _ in range(NUM_LAYERS):
        in_proj_w = nrm((3 * HIDDEN, HIDDEN))  # stacked [Wq; Wk; Wv] (PyTorch layout)
        in_proj_b = nrm((3 * HIDDEN,))
        out_proj_w = nrm((HIDDEN, HIDDEN))
        out_proj_b = nrm((HIDDEN,))
        w1_pt = nrm((MLP_DIM, HIDDEN)); b1_pt = nrm((MLP_DIM,))
        w2_pt = nrm((HIDDEN, MLP_DIM)); b2_pt = nrm((HIDDEN,))

        qkv_w_l.append(jnp.concatenate(
            [head_major(in_proj_w[i * HIDDEN:(i + 1) * HIDDEN].T) for i in range(3)],
            axis=0))                                               # (3H, E, Dh)
        qkv_b_l.append(jnp.concatenate(
            [in_proj_b[i * HIDDEN:(i + 1) * HIDDEN].reshape(NUM_HEADS, HEAD_DIM)
             for i in range(3)], axis=0))                          # (3H, Dh)
        out_w_l.append(out_proj_w.T)                               # (E, E)
        w1_l.append(w1_pt.T)                                       # (E, MLP)
        w2_l.append(w2_pt.T)                                       # (MLP, E)
        vec_l.append(jnp.stack([ones, zeros, out_proj_b, ones, zeros, b2_pt]))
        b1_l.append(b1_pt.reshape(1, MLP_DIM))

    return {
        "emb_w": emb_w,                                            # (PF, E) bf16
        "emb_add": emb_add,                                        # (SEQ_PAD, E) f32
        "qkv_w": jnp.stack(qkv_w_l).astype(jnp.bfloat16),          # (L, 3H, E, Dh)
        "qkv_b": jnp.stack(qkv_b_l),                               # (L, 3H, Dh) f32
        "out_w": jnp.stack(out_w_l).astype(jnp.bfloat16),          # (L, E, E)
        "mlp_w1": jnp.stack(w1_l).astype(jnp.bfloat16),            # (L, E, MLP)
        "mlp_w2": jnp.stack(w2_l).astype(jnp.bfloat16),            # (L, MLP, E)
        "vec": jnp.stack(vec_l),                                   # (L, 6, E) f32
        "b1": jnp.stack(b1_l),                                     # (L, 1, MLP) f32
        "lnf": jnp.stack([ones, zeros]),                           # (2, E) f32
        # lane-pad the 3-class head to 128 output lanes (zeros beyond NUM_CLASSES)
        "head_w": jnp.zeros((HIDDEN, HEAD_PAD), jnp.float32)
                     .at[:, :NUM_CLASSES].set(head_w_pt.T).astype(jnp.bfloat16),
        "head_b": jnp.zeros((1, HEAD_PAD), jnp.float32)
                     .at[0, :NUM_CLASSES].set(head_b_pt),
    }


# ------------------------------- forward --------------------------------------
def vit_forward(params, x):
    # x: (N, C, H, W) float32 (PyTorch NCHW)
    n = x.shape[0]
    # target ~TC_PARALLEL_STEPS parallel grid steps (v7x megacore) while folding
    # as many images as possible into each step's matmul M dimension.
    bt = max(1, n // TC_PARALLEL_STEPS)
    while n % bt:
        bt -= 1
    nh, nw = H // P, W // P

    # unfold into per-image patch rows (layout glue only; kernel does the matmul);
    # row 0 reserved for the class token, rows SEQ.. are sequence padding -> full
    # 8-sublane slabs.
    patches = (x.reshape(n, C, nh, P, nw, P)
                 .transpose(0, 2, 4, 1, 3, 5)
                 .reshape(n, N_PATCH, PATCH_FEAT))
    patches = jnp.pad(patches, ((0, 0), (1, SEQ_PAD - SEQ), (0, 0))).astype(jnp.bfloat16)

    emb_add = jnp.tile(params["emb_add"], (bt, 1))                 # (bt*SEQ_PAD, E)

    flat = [patches, params["emb_w"], emb_add, params["qkv_w"], params["qkv_b"],
            params["out_w"], params["mlp_w1"], params["mlp_w2"], params["vec"],
            params["b1"], params["lnf"], params["head_w"], params["head_b"]]

    # per-step image tile; packed weights are constant-index blocks fetched once
    in_specs = [pl.BlockSpec((bt, SEQ_PAD, PATCH_FEAT), lambda b: (b, 0, 0))]
    for a in flat[1:]:
        in_specs.append(pl.BlockSpec(a.shape, lambda b, nd=a.ndim: (0,) * nd))

    out = pl.pallas_call(
        functools.partial(vit_fused_kernel, bt=bt),
        grid=(n // bt,),
        in_specs=in_specs,
        out_specs=pl.BlockSpec((bt, 1, HEAD_PAD), lambda b: (b, 0, 0)),
        out_shape=jax.ShapeDtypeStruct((n, 1, HEAD_PAD), jnp.float32),
        compiler_params=pltpu.CompilerParams(
            dimension_semantics=("parallel",)),
    )(*flat)

    # trim the lane-padded head output back to NUM_CLASSES
    return out.reshape(n, HEAD_PAD)[:, :NUM_CLASSES]


# --------------------------------- main ---------------------------------------
if __name__ == "__main__":
    key = jax.random.PRNGKey(0)
    pkey, xkey = jax.random.split(key)
    params = init_params(pkey)
    x = jax.random.normal(xkey, (BATCH, C, H, W), dtype=jnp.float32)

    logits = jax.jit(vit_forward)(params, x)
    logits = jax.block_until_ready(logits)
    assert logits.shape == (BATCH, NUM_CLASSES)
    assert bool(jnp.all(jnp.isfinite(logits)))
    print("KERNEL_OK")
</pallas_src>

<mosaic_0001>
module attributes {stable_mosaic.version = 11 : i64} {
  func.func @vit_fused_kernel(%arg0: i32, %arg1: memref<1x8x192xbf16, #tpu.memory_space<vmem>>, %arg2: memref<192x32xbf16, #tpu.memory_space<vmem>>, %arg3: memref<8x32xf32, #tpu.memory_space<vmem>>, %arg4: memref<2x12x32x8xbf16, #tpu.memory_space<vmem>>, %arg5: memref<2x12x8xf32, #tpu.memory_space<vmem>>, %arg6: memref<2x32x32xbf16, #tpu.memory_space<vmem>>, %arg7: memref<2x32x64xbf16, #tpu.memory_space<vmem>>, %arg8: memref<2x64x32xbf16, #tpu.memory_space<vmem>>, %arg9: memref<2x6x32xf32, #tpu.memory_space<vmem>>, %arg10: memref<2x1x64xf32, #tpu.memory_space<vmem>>, %arg11: memref<2x32xf32, #tpu.memory_space<vmem>>, %arg12: memref<32x128xbf16, #tpu.memory_space<vmem>>, %arg13: memref<1x128xf32, #tpu.memory_space<vmem>>, %arg14: memref<1x1x128xf32, #tpu.memory_space<vmem>>) attributes {dimension_semantics = [#tpu.dimension_semantics<parallel>], iteration_bounds = array<i64: 2>, scalar_prefetch = 0 : i64, scratch_operands = 0 : i64, tpu.core_type = #tpu.core_type<tc>, window_params = [{transform_indices = @transform_0, window_bounds = array<i64: 1, 8, 192>}, {pipeline_mode = #tpu.pipeline_mode<synchronous>, transform_indices = @transform_1, window_bounds = array<i64: 192, 32>}, {pipeline_mode = #tpu.pipeline_mode<synchronous>, transform_indices = @transform_2, window_bounds = array<i64: 8, 32>}, {pipeline_mode = #tpu.pipeline_mode<synchronous>, transform_indices = @transform_3, window_bounds = array<i64: 2, 12, 32, 8>}, {pipeline_mode = #tpu.pipeline_mode<synchronous>, transform_indices = @transform_4, window_bounds = array<i64: 2, 12, 8>}, {pipeline_mode = #tpu.pipeline_mode<synchronous>, transform_indices = @transform_5, window_bounds = array<i64: 2, 32, 32>}, {pipeline_mode = #tpu.pipeline_mode<synchronous>, transform_indices = @transform_6, window_bounds = array<i64: 2, 32, 64>}, {pipeline_mode = #tpu.pipeline_mode<synchronous>, transform_indices = @transform_7, window_bounds = array<i64: 2, 64, 32>}, {pipeline_mode = #tpu.pipeline_mode<synchronous>, transform_indices = @transform_8, window_bounds = array<i64: 2, 6, 32>}, {pipeline_mode = #tpu.pipeline_mode<synchronous>, transform_indices = @transform_9, window_bounds = array<i64: 2, 1, 64>}, {pipeline_mode = #tpu.pipeline_mode<synchronous>, transform_indices = @transform_10, window_bounds = array<i64: 2, 32>}, {pipeline_mode = #tpu.pipeline_mode<synchronous>, transform_indices = @transform_11, window_bounds = array<i64: 32, 128>}, {pipeline_mode = #tpu.pipeline_mode<synchronous>, transform_indices = @transform_12, window_bounds = array<i64: 1, 128>}, {transform_indices = @transform_13, window_bounds = array<i64: 1, 1, 128>}]} {
    %c0 = arith.constant 0 : index
    %c0_0 = arith.constant 0 : index
    %c0_1 = arith.constant 0 : index
    %0 = vector.load %arg1[%c0, %c0_0, %c0_1] : memref<1x8x192xbf16, #tpu.memory_space<vmem>>, vector<1x8x192xbf16>
    %1 = vector.shape_cast %0 : vector<1x8x192xbf16> to vector<8x192xbf16>
    %c0_2 = arith.constant 0 : index
    %c0_3 = arith.constant 0 : index
    %2 = vector.load %arg2[%c0_2, %c0_3] : memref<192x32xbf16, #tpu.memory_space<vmem>>, vector<192x32xbf16>
    %cst = arith.constant dense<0.000000e+00> : vector<8x32xf32>
    %3 = tpu.matmul %1, %2, %cst {dimension_numbers = #tpu.dot_dimension_numbers<[1], [0], [0], [1], [0, 0, 1, 1], [], []>} : vector<8x192xbf16>, vector<192x32xbf16>, vector<8x32xf32> -> vector<8x32xf32>
    %c0_4 = arith.constant 0 : index
    %c0_5 = arith.constant 0 : index
    %4 = vector.load %arg3[%c0_4, %c0_5] : memref<8x32xf32, #tpu.memory_space<vmem>>, vector<8x32xf32>
    %5 = arith.addf %3, %4 : vector<8x32xf32>
    %6 = tpu.iota {dimensions = array<i32: 2>} : vector<1x1x8xi32>
    %c5_i32 = arith.constant 5 : i32
    %7 = vector.broadcast %c5_i32 : i32 to vector<1x1x8xi32>
    %8 = arith.cmpi slt, %6, %7 : vector<1x1x8xi32>
    %cst_6 = arith.constant 0.000000e+00 : f32
    %cst_7 = arith.constant -1.000000e+30 : f32
    %9 = vector.broadcast %cst_6 : f32 to vector<1x1x8xf32>
    %10 = vector.broadcast %cst_7 : f32 to vector<1x1x8xf32>
    %11 = arith.select %8, %9, %10 : vector<1x1x8xi1>, vector<1x1x8xf32>
    %c0_8 = arith.constant 0 : index
    %c0_9 = arith.constant 0 : index
    %c0_10 = arith.constant 0 : index
    %c0_11 = arith.constant 0 : index
    %12 = vector.load %arg4[%c0_8, %c0_9, %c0_10, %c0_11] : memref<2x12x32x8xbf16, #tpu.memory_space<vmem>>, vector<1x12x32x8xbf16>
    %13 = vector.shape_cast %12 : vector<1x12x32x8xbf16> to vector<12x32x8xbf16>
    %c0_12 = arith.constant 0 : index
    %c0_13 = arith.constant 0 : index
    %c0_14 = arith.constant 0 : index
    %14 = vector.load %arg5[%c0_12, %c0_13, %c0_14] : memref<2x12x8xf32, #tpu.memory_space<vmem>>, vector<1x12x8xf32>
    %15 = vector.shape_cast %14 : vector<1x12x8xf32> to vector<12x8xf32>
    %c0_15 = arith.constant 0 : index
    %c0_16 = arith.constant 0 : index
    %c0_17 = arith.constant 0 : index
    %16 = vector.load %arg6[%c0_15, %c0_16, %c0_17] : memref<2x32x32xbf16, #tpu.memory_space<vmem>>, vector<1x32x32xbf16>
    %17 = vector.shape_cast %16 : vector<1x32x32xbf16> to vector<32x32xbf16>
    %c0_18 = arith.constant 0 : index
    %c0_19 = arith.constant 0 : index
    %c0_20 = arith.constant 0 : index
    %18 = vector.load %arg7[%c0_18, %c0_19, %c0_20] : memref<2x32x64xbf16, #tpu.memory_space<vmem>>, vector<1x32x64xbf16>
    %19 = vector.shape_cast %18 : vector<1x32x64xbf16> to vector<32x64xbf16>
    %c0_21 = arith.constant 0 : index
    %c0_22 = arith.constant 0 : index
    %c0_23 = arith.constant 0 : index
    %20 = vector.load %arg8[%c0_21, %c0_22, %c0_23] : memref<2x64x32xbf16, #tpu.memory_space<vmem>>, vector<1x64x32xbf16>
    %21 = vector.shape_cast %20 : vector<1x64x32xbf16> to vector<64x32xbf16>
    %c0_24 = arith.constant 0 : index
    %c0_25 = arith.constant 0 : index
    %c0_26 = arith.constant 0 : index
    %22 = vector.load %arg9[%c0_24, %c0_25, %c0_26] : memref<2x6x32xf32, #tpu.memory_space<vmem>>, vector<1x6x32xf32>
    %23 = vector.shape_cast %22 : vector<1x6x32xf32> to vector<6x32xf32>
    %24 = vector.extract_strided_slice %23 {offsets = [0, 0], sizes = [1, 32], strides = [1, 1]} : vector<6x32xf32> to vector<1x32xf32>
    %25 = vector.extract_strided_slice %23 {offsets = [1, 0], sizes = [1, 32], strides = [1, 1]} : vector<6x32xf32> to vector<1x32xf32>
    %26 = vector.extract_strided_slice %23 {offsets = [2, 0], sizes = [1, 32], strides = [1, 1]} : vector<6x32xf32> to vector<1x32xf32>
    %27 = vector.extract_strided_slice %23 {offsets = [3, 0], sizes = [1, 32], strides = [1, 1]} : vector<6x32xf32> to vector<1x32xf32>
    %28 = vector.extract_strided_slice %23 {offsets = [4, 0], sizes = [1, 32], strides = [1, 1]} : vector<6x32xf32> to vector<1x32xf32>
    %29 = vector.extract_strided_slice %23 {offsets = [5, 0], sizes = [1, 32], strides = [1, 1]} : vector<6x32xf32> to vector<1x32xf32>
    %c0_27 = arith.constant 0 : index
    %c0_28 = arith.constant 0 : index
    %c0_29 = arith.constant 0 : index
    %30 = vector.load %arg10[%c0_27, %c0_28, %c0_29] : memref<2x1x64xf32, #tpu.memory_space<vmem>>, vector<1x1x64xf32>
    %31 = vector.shape_cast %30 : vector<1x1x64xf32> to vector<1x64xf32>
    %32 = vector.extract_strided_slice %13 {offsets = [0, 0, 0], sizes = [4, 32, 8], strides = [1, 1, 1]} : vector<12x32x8xbf16> to vector<4x32x8xbf16>
    %33 = vector.extract_strided_slice %13 {offsets = [4, 0, 0], sizes = [4, 32, 8], strides = [1, 1, 1]} : vector<12x32x8xbf16> to vector<4x32x8xbf16>
    %34 = vector.extract_strided_slice %13 {offsets = [8, 0, 0], sizes = [4, 32, 8], strides = [1, 1, 1]} : vector<12x32x8xbf16> to vector<4x32x8xbf16>
    %35 = vector.extract_strided_slice %15 {offsets = [0, 0], sizes = [4, 8], strides = [1, 1]} : vector<12x8xf32> to vector<4x8xf32>
    %36 = vector.extract_strided_slice %15 {offsets = [4, 0], sizes = [4, 8], strides = [1, 1]} : vector<12x8xf32> to vector<4x8xf32>
    %37 = vector.extract_strided_slice %15 {offsets = [8, 0], sizes = [4, 8], strides = [1, 1]} : vector<12x8xf32> to vector<4x8xf32>
    %cst_30 = arith.constant dense<0.000000e+00> : vector<8xf32>
    %38 = vector.multi_reduction <add>, %5, %cst_30 [1] : vector<8x32xf32> to vector<8xf32>
    %39 = vector.shape_cast %38 : vector<8xf32> to vector<8x1xf32>
    %cst_31 = arith.constant 3.200000e+01 : f32
    %40 = vector.broadcast %cst_31 : f32 to vector<8x1xf32>
    %41 = arith.divf %39, %40 : vector<8x1xf32>
    %42 = vector.broadcast %41 : vector<8x1xf32> to vector<8x32xf32>
    %43 = arith.subf %5, %42 : vector<8x32xf32>
    %44 = arith.mulf %43, %43 : vector<8x32xf32>
    %cst_32 = arith.constant dense<0.000000e+00> : vector<8xf32>
    %45 = vector.multi_reduction <add>, %44, %cst_32 [1] : vector<8x32xf32> to vector<8xf32>
    %46 = vector.shape_cast %45 : vector<8xf32> to vector<8x1xf32>
    %cst_33 = arith.constant 3.200000e+01 : f32
    %47 = vector.broadcast %cst_33 : f32 to vector<8x1xf32>
    %48 = arith.divf %46, %47 : vector<8x1xf32>
    %49 = vector.broadcast %41 : vector<8x1xf32> to vector<8x32xf32>
    %50 = arith.subf %5, %49 : vector<8x32xf32>
    %cst_34 = arith.constant 9.99999997E-7 : f32
    %51 = vector.broadcast %cst_34 : f32 to vector<8x1xf32>
    %52 = arith.addf %48, %51 : vector<8x1xf32>
    %53 = math.rsqrt %52 : vector<8x1xf32>
    %54 = vector.broadcast %53 : vector<8x1xf32> to vector<8x32xf32>
    %55 = arith.mulf %50, %54 : vector<8x32xf32>
    %56 = vector.broadcast %24 : vector<1x32xf32> to vector<8x32xf32>
    %57 = arith.mulf %55, %56 : vector<8x32xf32>
    %58 = vector.broadcast %25 : vector<1x32xf32> to vector<8x32xf32>
    %59 = arith.addf %57, %58 : vector<8x32xf32>
    %60 = arith.truncf %59 : vector<8x32xf32> to vector<8x32xbf16>
    %61 = vector.shape_cast %60 : vector<8x32xbf16> to vector<1x8x32xbf16>
    %62 = vector.broadcast %61 : vector<1x8x32xbf16> to vector<4x8x32xbf16>
    %cst_35 = arith.constant dense<0.000000e+00> : vector<4x8x8xf32>
    %63 = tpu.matmul %62, %32, %cst_35 {dimension_numbers = #tpu.dot_dimension_numbers<[2], [1], [1], [2], [0, 0, 0, 1, 1, 2], [0], [0]>} : vector<4x8x32xbf16>, vector<4x32x8xbf16>, vector<4x8x8xf32> -> vector<4x8x8xf32>
    %64 = vector.shape_cast %35 : vector<4x8xf32> to vector<4x1x8xf32>
    %65 = vector.broadcast %64 : vector<4x1x8xf32> to vector<4x8x8xf32>
    %66 = arith.addf %63, %65 : vector<4x8x8xf32>
    %cst_36 = arith.constant dense<0.000000e+00> : vector<4x8x8xf32>
    %67 = tpu.matmul %62, %33, %cst_36 {dimension_numbers = #tpu.dot_dimension_numbers<[2], [1], [1], [2], [0, 0, 0, 1, 1, 2], [0], [0]>} : vector<4x8x32xbf16>, vector<4x32x8xbf16>, vector<4x8x8xf32> -> vector<4x8x8xf32>
    %68 = vector.shape_cast %36 : vector<4x8xf32> to vector<4x1x8xf32>
    %69 = vector.broadcast %68 : vector<4x1x8xf32> to vector<4x8x8xf32>
    %70 = arith.addf %67, %69 : vector<4x8x8xf32>
    %cst_37 = arith.constant dense<0.000000e+00> : vector<4x8x8xf32>
    %71 = tpu.matmul %62, %34, %cst_37 {dimension_numbers = #tpu.dot_dimension_numbers<[2], [1], [1], [2], [0, 0, 0, 1, 1, 2], [0], [0]>} : vector<4x8x32xbf16>, vector<4x32x8xbf16>, vector<4x8x8xf32> -> vector<4x8x8xf32>
    %72 = vector.shape_cast %37 : vector<4x8xf32> to vector<4x1x8xf32>
    %73 = vector.broadcast %72 : vector<4x1x8xf32> to vector<4x8x8xf32>
    %74 = arith.addf %71, %73 : vector<4x8x8xf32>
    %75 = arith.truncf %66 : vector<4x8x8xf32> to vector<4x8x8xbf16>
    %76 = arith.truncf %70 : vector<4x8x8xf32> to vector<4x8x8xbf16>
    %77 = arith.truncf %74 : vector<4x8x8xf32> to vector<4x8x8xbf16>
    %cst_38 = arith.constant dense<0.000000e+00> : vector<4x8x8xf32>
    %78 = tpu.matmul %75, %76, %cst_38 {dimension_numbers = #tpu.dot_dimension_numbers<[2], [2], [1], [1], [0, 0, 0, 1, 1, 1], [0], [0]>} : vector<4x8x8xbf16>, vector<4x8x8xbf16>, vector<4x8x8xf32> -> vector<4x8x8xf32>
    %cst_39 = arith.constant 0.353553385 : f32
    %79 = vector.broadcast %cst_39 : f32 to vector<4x8x8xf32>
    %80 = arith.mulf %78, %79 : vector<4x8x8xf32>
    %81 = vector.broadcast %11 : vector<1x1x8xf32> to vector<4x8x8xf32>
    %82 = arith.addf %80, %81 : vector<4x8x8xf32>
    %cst_40 = arith.constant dense<0xFF800000> : vector<4x8xf32>
    %83 = vector.multi_reduction <maximumf>, %82, %cst_40 [2] : vector<4x8x8xf32> to vector<4x8xf32>
    %84 = vector.shape_cast %83 : vector<4x8xf32> to vector<4x8x1xf32>
    %85 = vector.broadcast %84 : vector<4x8x1xf32> to vector<4x8x8xf32>
    %86 = arith.subf %82, %85 : vector<4x8x8xf32>
    %87 = math.exp %86 : vector<4x8x8xf32>
    %cst_41 = arith.constant dense<0.000000e+00> : vector<4x8xf32>
    %88 = vector.multi_reduction <add>, %87, %cst_41 [2] : vector<4x8x8xf32> to vector<4x8xf32>
    %89 = vector.shape_cast %88 : vector<4x8xf32> to vector<4x8x1xf32>
    %90 = tpu.reciprocal %89 {approx = true} : vector<4x8x1xf32> -> vector<4x8x1xf32>
    %91 = vector.broadcast %90 : vector<4x8x1xf32> to vector<4x8x8xf32>
    %92 = arith.mulf %87, %91 : vector<4x8x8xf32>
    %93 = arith.truncf %92 : vector<4x8x8xf32> to vector<4x8x8xbf16>
    %cst_42 = arith.constant dense<0.000000e+00> : vector<4x8x8xf32>
    %94 = tpu.matmul %93, %77, %cst_42 {dimension_numbers = #tpu.dot_dimension_numbers<[2], [1], [1], [2], [0, 0, 0, 1, 1, 2], [0], [0]>} : vector<4x8x8xbf16>, vector<4x8x8xbf16>, vector<4x8x8xf32> -> vector<4x8x8xf32>
    %95 = vector.extract_strided_slice %94 {offsets = [0, 0, 0], sizes = [1, 8, 8], strides = [1, 1, 1]} : vector<4x8x8xf32> to vector<1x8x8xf32>
    %96 = vector.shape_cast %95 : vector<1x8x8xf32> to vector<8x8xf32>
    %97 = vector.extract_strided_slice %94 {offsets = [1, 0, 0], sizes = [1, 8, 8], strides = [1, 1, 1]} : vector<4x8x8xf32> to vector<1x8x8xf32>
    %98 = vector.shape_cast %97 : vector<1x8x8xf32> to vector<8x8xf32>
    %99 = vector.extract_strided_slice %94 {offsets = [2, 0, 0], sizes = [1, 8, 8], strides = [1, 1, 1]} : vector<4x8x8xf32> to vector<1x8x8xf32>
    %100 = vector.shape_cast %99 : vector<1x8x8xf32> to vector<8x8xf32>
    %101 = vector.extract_strided_slice %94 {offsets = [3, 0, 0], sizes = [1, 8, 8], strides = [1, 1, 1]} : vector<4x8x8xf32> to vector<1x8x8xf32>
    %102 = vector.shape_cast %101 : vector<1x8x8xf32> to vector<8x8xf32>
    %103 = tpu.concatenate %96, %98, %100, %102 in 1 : vector<8x8xf32>, vector<8x8xf32>, vector<8x8xf32>, vector<8x8xf32> -> vector<8x32xf32>
    %104 = arith.truncf %103 : vector<8x32xf32> to vector<8x32xbf16>
    %cst_43 = arith.constant dense<0.000000e+00> : vector<8x32xf32>
    %105 = tpu.matmul %104, %17, %cst_43 {dimension_numbers = #tpu.dot_dimension_numbers<[1], [0], [0], [1], [0, 0, 1, 1], [], []>} : vector<8x32xbf16>, vector<32x32xbf16>, vector<8x32xf32> -> vector<8x32xf32>
    %106 = vector.broadcast %26 : vector<1x32xf32> to vector<8x32xf32>
    %107 = arith.addf %105, %106 : vector<8x32xf32>
    %108 = arith.addf %5, %107 : vector<8x32xf32>
    %cst_44 = arith.constant dense<0.000000e+00> : vector<8xf32>
    %109 = vector.multi_reduction <add>, %108, %cst_44 [1] : vector<8x32xf32> to vector<8xf32>
    %110 = vector.shape_cast %109 : vector<8xf32> to vector<8x1xf32>
    %cst_45 = arith.constant 3.200000e+01 : f32
    %111 = vector.broadcast %cst_45 : f32 to vector<8x1xf32>
    %112 = arith.divf %110, %111 : vector<8x1xf32>
    %113 = vector.broadcast %112 : vector<8x1xf32> to vector<8x32xf32>
    %114 = arith.subf %108, %113 : vector<8x32xf32>
    %115 = arith.mulf %114, %114 : vector<8x32xf32>
    %cst_46 = arith.constant dense<0.000000e+00> : vector<8xf32>
    %116 = vector.multi_reduction <add>, %115, %cst_46 [1] : vector<8x32xf32> to vector<8xf32>
    %117 = vector.shape_cast %116 : vector<8xf32> to vector<8x1xf32>
    %cst_47 = arith.constant 3.200000e+01 : f32
    %118 = vector.broadcast %cst_47 : f32 to vector<8x1xf32>
    %119 = arith.divf %117, %118 : vector<8x1xf32>
    %120 = vector.broadcast %112 : vector<8x1xf32> to vector<8x32xf32>
    %121 = arith.subf %108, %120 : vector<8x32xf32>
    %cst_48 = arith.constant 9.99999997E-7 : f32
    %122 = vector.broadcast %cst_48 : f32 to vector<8x1xf32>
    %123 = arith.addf %119, %122 : vector<8x1xf32>
    %124 = math.rsqrt %123 : vector<8x1xf32>
    %125 = vector.broadcast %124 : vector<8x1xf32> to vector<8x32xf32>
    %126 = arith.mulf %121, %125 : vector<8x32xf32>
    %127 = vector.broadcast %27 : vector<1x32xf32> to vector<8x32xf32>
    %128 = arith.mulf %126, %127 : vector<8x32xf32>
    %129 = vector.broadcast %28 : vector<1x32xf32> to vector<8x32xf32>
    %130 = arith.addf %128, %129 : vector<8x32xf32>
    %131 = arith.truncf %130 : vector<8x32xf32> to vector<8x32xbf16>
    %cst_49 = arith.constant dense<0.000000e+00> : vector<8x64xf32>
    %132 = tpu.matmul %131, %19, %cst_49 {dimension_numbers = #tpu.dot_dimension_numbers<[1], [0], [0], [1], [0, 0, 1, 1], [], []>} : vector<8x32xbf16>, vector<32x64xbf16>, vector<8x64xf32> -> vector<8x64xf32>
    %133 = vector.broadcast %31 : vector<1x64xf32> to vector<8x64xf32>
    %134 = arith.addf %132, %133 : vector<8x64xf32>
    %cst_50 = arith.constant 5.000000e-01 : f32
    %135 = vector.broadcast %cst_50 : f32 to vector<8x64xf32>
    %136 = arith.mulf %135, %134 : vector<8x64xf32>
    %cst_51 = arith.constant 4.471500e-02 : f32
    %137 = vector.broadcast %cst_51 : f32 to vector<8x64xf32>
    %138 = arith.mulf %137, %134 : vector<8x64xf32>
    %139 = arith.mulf %138, %134 : vector<8x64xf32>
    %140 = arith.mulf %139, %134 : vector<8x64xf32>
    %141 = arith.addf %134, %140 : vector<8x64xf32>
    %cst_52 = arith.constant 0.797884583 : f32
    %142 = vector.broadcast %cst_52 : f32 to vector<8x64xf32>
    %143 = arith.mulf %142, %141 : vector<8x64xf32>
    %144 = math.tanh %143 : vector<8x64xf32>
    %cst_53 = arith.constant 1.000000e+00 : f32
    %145 = vector.broadcast %cst_53 : f32 to vector<8x64xf32>
    %146 = arith.addf %145, %144 : vector<8x64xf32>
    %147 = arith.mulf %136, %146 : vector<8x64xf32>
    %148 = arith.truncf %147 : vector<8x64xf32> to vector<8x64xbf16>
    %cst_54 = arith.constant dense<0.000000e+00> : vector<8x32xf32>
    %149 = tpu.matmul %148, %21, %cst_54 {dimension_numbers = #tpu.dot_dimension_numbers<[1], [0], [0], [1], [0, 0, 1, 1], [], []>} : vector<8x64xbf16>, vector<64x32xbf16>, vector<8x32xf32> -> vector<8x32xf32>
    %150 = vector.broadcast %29 : vector<1x32xf32> to vector<8x32xf32>
    %151 = arith.addf %149, %150 : vector<8x32xf32>
    %152 = arith.addf %108, %151 : vector<8x32xf32>
    %c1 = arith.constant 1 : index
    %c0_55 = arith.constant 0 : index
    %c0_56 = arith.constant 0 : index
    %c0_57 = arith.constant 0 : index
    %153 = vector.load %arg4[%c1, %c0_55, %c0_56, %c0_57] : memref<2x12x32x8xbf16, #tpu.memory_space<vmem>>, vector<1x12x32x8xbf16>
    %154 = vector.shape_cast %153 : vector<1x12x32x8xbf16> to vector<12x32x8xbf16>
    %c1_58 = arith.constant 1 : index
    %c0_59 = arith.constant 0 : index
    %c0_60 = arith.constant 0 : index
    %155 = vector.load %arg5[%c1_58, %c0_59, %c0_60] : memref<2x12x8xf32, #tpu.memory_space<vmem>>, vector<1x12x8xf32>
    %156 = vector.shape_cast %155 : vector<1x12x8xf32> to vector<12x8xf32>
    %c1_61 = arith.constant 1 : index
    %c0_62 = arith.constant 0 : index
    %c0_63 = arith.constant 0 : index
    %157 = vector.load %arg6[%c1_61, %c0_62, %c0_63] : memref<2x32x32xbf16, #tpu.memory_space<vmem>>, vector<1x32x32xbf16>
    %158 = vector.shape_cast %157 : vector<1x32x32xbf16> to vector<32x32xbf16>
    %c1_64 = arith.constant 1 : index
    %c0_65 = arith.constant 0 : index
    %c0_66 = arith.constant 0 : index
    %159 = vector.load %arg7[%c1_64, %c0_65, %c0_66] : memref<2x32x64xbf16, #tpu.memory_space<vmem>>, vector<1x32x64xbf16>
    %160 = vector.shape_cast %159 : vector<1x32x64xbf16> to vector<32x64xbf16>
    %c1_67 = arith.constant 1 : index
    %c0_68 = arith.constant 0 : index
    %c0_69 = arith.constant 0 : index
    %161 = vector.load %arg8[%c1_67, %c0_68, %c0_69] : memref<2x64x32xbf16, #tpu.memory_space<vmem>>, vector<1x64x32xbf16>
    %162 = vector.shape_cast %161 : vector<1x64x32xbf16> to vector<64x32xbf16>
    %c1_70 = arith.constant 1 : index
    %c0_71 = arith.constant 0 : index
    %c0_72 = arith.constant 0 : index
    %163 = vector.load %arg9[%c1_70, %c0_71, %c0_72] : memref<2x6x32xf32, #tpu.memory_space<vmem>>, vector<1x6x32xf32>
    %164 = vector.shape_cast %163 : vector<1x6x32xf32> to vector<6x32xf32>
    %165 = vector.extract_strided_slice %164 {offsets = [0, 0], sizes = [1, 32], strides = [1, 1]} : vector<6x32xf32> to vector<1x32xf32>
    %166 = vector.extract_strided_slice %164 {offsets = [1, 0], sizes = [1, 32], strides = [1, 1]} : vector<6x32xf32> to vector<1x32xf32>
    %167 = vector.extract_strided_slice %164 {offsets = [2, 0], sizes = [1, 32], strides = [1, 1]} : vector<6x32xf32> to vector<1x32xf32>
    %168 = vector.extract_strided_slice %164 {offsets = [3, 0], sizes = [1, 32], strides = [1, 1]} : vector<6x32xf32> to vector<1x32xf32>
    %169 = vector.extract_strided_slice %164 {offsets = [4, 0], sizes = [1, 32], strides = [1, 1]} : vector<6x32xf32> to vector<1x32xf32>
    %170 = vector.extract_strided_slice %164 {offsets = [5, 0], sizes = [1, 32], strides = [1, 1]} : vector<6x32xf32> to vector<1x32xf32>
    %c1_73 = arith.constant 1 : index
    %c0_74 = arith.constant 0 : index
    %c0_75 = arith.constant 0 : index
    %171 = vector.load %arg10[%c1_73, %c0_74, %c0_75] : memref<2x1x64xf32, #tpu.memory_space<vmem>>, vector<1x1x64xf32>
    %172 = vector.shape_cast %171 : vector<1x1x64xf32> to vector<1x64xf32>
    %173 = vector.extract_strided_slice %154 {offsets = [0, 0, 0], sizes = [4, 32, 8], strides = [1, 1, 1]} : vector<12x32x8xbf16> to vector<4x32x8xbf16>
    %174 = vector.extract_strided_slice %154 {offsets = [4, 0, 0], sizes = [4, 32, 8], strides = [1, 1, 1]} : vector<12x32x8xbf16> to vector<4x32x8xbf16>
    %175 = vector.extract_strided_slice %154 {offsets = [8, 0, 0], sizes = [4, 32, 8], strides = [1, 1, 1]} : vector<12x32x8xbf16> to vector<4x32x8xbf16>
    %176 = vector.extract_strided_slice %156 {offsets = [0, 0], sizes = [4, 8], strides = [1, 1]} : vector<12x8xf32> to vector<4x8xf32>
    %177 = vector.extract_strided_slice %156 {offsets = [4, 0], sizes = [4, 8], strides = [1, 1]} : vector<12x8xf32> to vector<4x8xf32>
    %178 = vector.extract_strided_slice %156 {offsets = [8, 0], sizes = [4, 8], strides = [1, 1]} : vector<12x8xf32> to vector<4x8xf32>
    %cst_76 = arith.constant dense<0.000000e+00> : vector<8xf32>
    %179 = vector.multi_reduction <add>, %152, %cst_76 [1] : vector<8x32xf32> to vector<8xf32>
    %180 = vector.shape_cast %179 : vector<8xf32> to vector<8x1xf32>
    %cst_77 = arith.constant 3.200000e+01 : f32
    %181 = vector.broadcast %cst_77 : f32 to vector<8x1xf32>
    %182 = arith.divf %180, %181 : vector<8x1xf32>
    %183 = vector.broadcast %182 : vector<8x1xf32> to vector<8x32xf32>
    %184 = arith.subf %152, %183 : vector<8x32xf32>
    %185 = arith.mulf %184, %184 : vector<8x32xf32>
    %cst_78 = arith.constant dense<0.000000e+00> : vector<8xf32>
    %186 = vector.multi_reduction <add>, %185, %cst_78 [1] : vector<8x32xf32> to vector<8xf32>
    %187 = vector.shape_cast %186 : vector<8xf32> to vector<8x1xf32>
    %cst_79 = arith.constant 3.200000e+01 : f32
    %188 = vector.broadcast %cst_79 : f32 to vector<8x1xf32>
    %189 = arith.divf %187, %188 : vector<8x1xf32>
    %190 = vector.broadcast %182 : vector<8x1xf32> to vector<8x32xf32>
    %191 = arith.subf %152, %190 : vector<8x32xf32>
    %cst_80 = arith.constant 9.99999997E-7 : f32
    %192 = vector.broadcast %cst_80 : f32 to vector<8x1xf32>
    %193 = arith.addf %189, %192 : vector<8x1xf32>
    %194 = math.rsqrt %193 : vector<8x1xf32>
    %195 = vector.broadcast %194 : vector<8x1xf32> to vector<8x32xf32>
    %196 = arith.mulf %191, %195 : vector<8x32xf32>
    %197 = vector.broadcast %165 : vector<1x32xf32> to vector<8x32xf32>
    %198 = arith.mulf %196, %197 : vector<8x32xf32>
    %199 = vector.broadcast %166 : vector<1x32xf32> to vector<8x32xf32>
    %200 = arith.addf %198, %199 : vector<8x32xf32>
    %201 = arith.truncf %200 : vector<8x32xf32> to vector<8x32xbf16>
    %202 = vector.shape_cast %201 : vector<8x32xbf16> to vector<1x8x32xbf16>
    %203 = vector.broadcast %202 : vector<1x8x32xbf16> to vector<4x8x32xbf16>
    %cst_81 = arith.constant dense<0.000000e+00> : vector<4x8x8xf32>
    %204 = tpu.matmul %203, %173, %cst_81 {dimension_numbers = #tpu.dot_dimension_numbers<[2], [1], [1], [2], [0, 0, 0, 1, 1, 2], [0], [0]>} : vector<4x8x32xbf16>, vector<4x32x8xbf16>, vector<4x8x8xf32> -> vector<4x8x8xf32>
    %205 = vector.shape_cast %176 : vector<4x8xf32> to vector<4x1x8xf32>
    %206 = vector.broadcast %205 : vector<4x1x8xf32> to vector<4x8x8xf32>
    %207 = arith.addf %204, %206 : vector<4x8x8xf32>
    %cst_82 = arith.constant dense<0.000000e+00> : vector<4x8x8xf32>
    %208 = tpu.matmul %203, %174, %cst_82 {dimension_numbers = #tpu.dot_dimension_numbers<[2], [1], [1], [2], [0, 0, 0, 1, 1, 2], [0], [0]>} : vector<4x8x32xbf16>, vector<4x32x8xbf16>, vector<4x8x8xf32> -> vector<4x8x8xf32>
    %209 = vector.shape_cast %177 : vector<4x8xf32> to vector<4x1x8xf32>
    %210 = vector.broadcast %209 : vector<4x1x8xf32> to vector<4x8x8xf32>
    %211 = arith.addf %208, %210 : vector<4x8x8xf32>
    %cst_83 = arith.constant dense<0.000000e+00> : vector<4x8x8xf32>
    %212 = tpu.matmul %203, %175, %cst_83 {dimension_numbers = #tpu.dot_dimension_numbers<[2], [1], [1], [2], [0, 0, 0, 1, 1, 2], [0], [0]>} : vector<4x8x32xbf16>, vector<4x32x8xbf16>, vector<4x8x8xf32> -> vector<4x8x8xf32>
    %213 = vector.shape_cast %178 : vector<4x8xf32> to vector<4x1x8xf32>
    %214 = vector.broadcast %213 : vector<4x1x8xf32> to vector<4x8x8xf32>
    %215 = arith.addf %212, %214 : vector<4x8x8xf32>
    %216 = arith.truncf %207 : vector<4x8x8xf32> to vector<4x8x8xbf16>
    %217 = arith.truncf %211 : vector<4x8x8xf32> to vector<4x8x8xbf16>
    %218 = arith.truncf %215 : vector<4x8x8xf32> to vector<4x8x8xbf16>
    %cst_84 = arith.constant dense<0.000000e+00> : vector<4x8x8xf32>
    %219 = tpu.matmul %216, %217, %cst_84 {dimension_numbers = #tpu.dot_dimension_numbers<[2], [2], [1], [1], [0, 0, 0, 1, 1, 1], [0], [0]>} : vector<4x8x8xbf16>, vector<4x8x8xbf16>, vector<4x8x8xf32> -> vector<4x8x8xf32>
    %cst_85 = arith.constant 0.353553385 : f32
    %220 = vector.broadcast %cst_85 : f32 to vector<4x8x8xf32>
    %221 = arith.mulf %219, %220 : vector<4x8x8xf32>
    %222 = vector.broadcast %11 : vector<1x1x8xf32> to vector<4x8x8xf32>
    %223 = arith.addf %221, %222 : vector<4x8x8xf32>
    %cst_86 = arith.constant dense<0xFF800000> : vector<4x8xf32>
    %224 = vector.multi_reduction <maximumf>, %223, %cst_86 [2] : vector<4x8x8xf32> to vector<4x8xf32>
    %225 = vector.shape_cast %224 : vector<4x8xf32> to vector<4x8x1xf32>
    %226 = vector.broadcast %225 : vector<4x8x1xf32> to vector<4x8x8xf32>
    %227 = arith.subf %223, %226 : vector<4x8x8xf32>
    %228 = math.exp %227 : vector<4x8x8xf32>
    %cst_87 = arith.constant dense<0.000000e+00> : vector<4x8xf32>
    %229 = vector.multi_reduction <add>, %228, %cst_87 [2] : vector<4x8x8xf32> to vector<4x8xf32>
    %230 = vector.shape_cast %229 : vector<4x8xf32> to vector<4x8x1xf32>
    %231 = tpu.reciprocal %230 {approx = true} : vector<4x8x1xf32> -> vector<4x8x1xf32>
    %232 = vector.broadcast %231 : vector<4x8x1xf32> to vector<4x8x8xf32>
    %233 = arith.mulf %228, %232 : vector<4x8x8xf32>
    %234 = arith.truncf %233 : vector<4x8x8xf32> to vector<4x8x8xbf16>
    %cst_88 = arith.constant dense<0.000000e+00> : vector<4x8x8xf32>
    %235 = tpu.matmul %234, %218, %cst_88 {dimension_numbers = #tpu.dot_dimension_numbers<[2], [1], [1], [2], [0, 0, 0, 1, 1, 2], [0], [0]>} : vector<4x8x8xbf16>, vector<4x8x8xbf16>, vector<4x8x8xf32> -> vector<4x8x8xf32>
    %236 = vector.extract_strided_slice %235 {offsets = [0, 0, 0], sizes = [1, 8, 8], strides = [1, 1, 1]} : vector<4x8x8xf32> to vector<1x8x8xf32>
    %237 = vector.shape_cast %236 : vector<1x8x8xf32> to vector<8x8xf32>
    %238 = vector.extract_strided_slice %235 {offsets = [1, 0, 0], sizes = [1, 8, 8], strides = [1, 1, 1]} : vector<4x8x8xf32> to vector<1x8x8xf32>
    %239 = vector.shape_cast %238 : vector<1x8x8xf32> to vector<8x8xf32>
    %240 = vector.extract_strided_slice %235 {offsets = [2, 0, 0], sizes = [1, 8, 8], strides = [1, 1, 1]} : vector<4x8x8xf32> to vector<1x8x8xf32>
    %241 = vector.shape_cast %240 : vector<1x8x8xf32> to vector<8x8xf32>
    %242 = vector.extract_strided_slice %235 {offsets = [3, 0, 0], sizes = [1, 8, 8], strides = [1, 1, 1]} : vector<4x8x8xf32> to vector<1x8x8xf32>
    %243 = vector.shape_cast %242 : vector<1x8x8xf32> to vector<8x8xf32>
    %244 = tpu.concatenate %237, %239, %241, %243 in 1 : vector<8x8xf32>, vector<8x8xf32>, vector<8x8xf32>, vector<8x8xf32> -> vector<8x32xf32>
    %245 = arith.truncf %244 : vector<8x32xf32> to vector<8x32xbf16>
    %cst_89 = arith.constant dense<0.000000e+00> : vector<8x32xf32>
    %246 = tpu.matmul %245, %158, %cst_89 {dimension_numbers = #tpu.dot_dimension_numbers<[1], [0], [0], [1], [0, 0, 1, 1], [], []>} : vector<8x32xbf16>, vector<32x32xbf16>, vector<8x32xf32> -> vector<8x32xf32>
    %247 = vector.broadcast %167 : vector<1x32xf32> to vector<8x32xf32>
    %248 = arith.addf %246, %247 : vector<8x32xf32>
    %249 = arith.addf %152, %248 : vector<8x32xf32>
    %cst_90 = arith.constant dense<0.000000e+00> : vector<8xf32>
    %250 = vector.multi_reduction <add>, %249, %cst_90 [1] : vector<8x32xf32> to vector<8xf32>
    %251 = vector.shape_cast %250 : vector<8xf32> to vector<8x1xf32>
    %cst_91 = arith.constant 3.200000e+01 : f32
    %252 = vector.broadcast %cst_91 : f32 to vector<8x1xf32>
    %253 = arith.divf %251, %252 : vector<8x1xf32>
    %254 = vector.broadcast %253 : vector<8x1xf32> to vector<8x32xf32>
    %255 = arith.subf %249, %254 : vector<8x32xf32>
    %256 = arith.mulf %255, %255 : vector<8x32xf32>
    %cst_92 = arith.constant dense<0.000000e+00> : vector<8xf32>
    %257 = vector.multi_reduction <add>, %256, %cst_92 [1] : vector<8x32xf32> to vector<8xf32>
    %258 = vector.shape_cast %257 : vector<8xf32> to vector<8x1xf32>
    %cst_93 = arith.constant 3.200000e+01 : f32
    %259 = vector.broadcast %cst_93 : f32 to vector<8x1xf32>
    %260 = arith.divf %258, %259 : vector<8x1xf32>
    %261 = vector.broadcast %253 : vector<8x1xf32> to vector<8x32xf32>
    %262 = arith.subf %249, %261 : vector<8x32xf32>
    %cst_94 = arith.constant 9.99999997E-7 : f32
    %263 = vector.broadcast %cst_94 : f32 to vector<8x1xf32>
    %264 = arith.addf %260, %263 : vector<8x1xf32>
    %265 = math.rsqrt %264 : vector<8x1xf32>
    %266 = vector.broadcast %265 : vector<8x1xf32> to vector<8x32xf32>
    %267 = arith.mulf %262, %266 : vector<8x32xf32>
    %268 = vector.broadcast %168 : vector<1x32xf32> to vector<8x32xf32>
    %269 = arith.mulf %267, %268 : vector<8x32xf32>
    %270 = vector.broadcast %169 : vector<1x32xf32> to vector<8x32xf32>
    %271 = arith.addf %269, %270 : vector<8x32xf32>
    %272 = arith.truncf %271 : vector<8x32xf32> to vector<8x32xbf16>
    %cst_95 = arith.constant dense<0.000000e+00> : vector<8x64xf32>
    %273 = tpu.matmul %272, %160, %cst_95 {dimension_numbers = #tpu.dot_dimension_numbers<[1], [0], [0], [1], [0, 0, 1, 1], [], []>} : vector<8x32xbf16>, vector<32x64xbf16>, vector<8x64xf32> -> vector<8x64xf32>
    %274 = vector.broadcast %172 : vector<1x64xf32> to vector<8x64xf32>
    %275 = arith.addf %273, %274 : vector<8x64xf32>
    %cst_96 = arith.constant 5.000000e-01 : f32
    %276 = vector.broadcast %cst_96 : f32 to vector<8x64xf32>
    %277 = arith.mulf %276, %275 : vector<8x64xf32>
    %cst_97 = arith.constant 4.471500e-02 : f32
    %278 = vector.broadcast %cst_97 : f32 to vector<8x64xf32>
    %279 = arith.mulf %278, %275 : vector<8x64xf32>
    %280 = arith.mulf %279, %275 : vector<8x64xf32>
    %281 = arith.mulf %280, %275 : vector<8x64xf32>
    %282 = arith.addf %275, %281 : vector<8x64xf32>
    %cst_98 = arith.constant 0.797884583 : f32
    %283 = vector.broadcast %cst_98 : f32 to vector<8x64xf32>
    %284 = arith.mulf %283, %282 : vector<8x64xf32>
    %285 = math.tanh %284 : vector<8x64xf32>
    %cst_99 = arith.constant 1.000000e+00 : f32
    %286 = vector.broadcast %cst_99 : f32 to vector<8x64xf32>
    %287 = arith.addf %286, %285 : vector<8x64xf32>
    %288 = arith.mulf %277, %287 : vector<8x64xf32>
    %289 = arith.truncf %288 : vector<8x64xf32> to vector<8x64xbf16>
    %cst_100 = arith.constant dense<0.000000e+00> : vector<8x32xf32>
    %290 = tpu.matmul %289, %162, %cst_100 {dimension_numbers = #tpu.dot_dimension_numbers<[1], [0], [0], [1], [0, 0, 1, 1], [], []>} : vector<8x64xbf16>, vector<64x32xbf16>, vector<8x32xf32> -> vector<8x32xf32>
    %291 = vector.broadcast %170 : vector<1x32xf32> to vector<8x32xf32>
    %292 = arith.addf %290, %291 : vector<8x32xf32>
    %293 = arith.addf %249, %292 : vector<8x32xf32>
    %c0_101 = arith.constant 0 : index
    %c0_102 = arith.constant 0 : index
    %294 = vector.load %arg11[%c0_101, %c0_102] : memref<2x32xf32, #tpu.memory_space<vmem>>, vector<2x32xf32>
    %295 = vector.extract_strided_slice %294 {offsets = [0, 0], sizes = [1, 32], strides = [1, 1]} : vector<2x32xf32> to vector<1x32xf32>
    %296 = vector.extract_strided_slice %294 {offsets = [1, 0], sizes = [1, 32], strides = [1, 1]} : vector<2x32xf32> to vector<1x32xf32>
    %cst_103 = arith.constant dense<0.000000e+00> : vector<8xf32>
    %297 = vector.multi_reduction <add>, %293, %cst_103 [1] : vector<8x32xf32> to vector<8xf32>
    %298 = vector.shape_cast %297 : vector<8xf32> to vector<8x1xf32>
    %cst_104 = arith.constant 3.200000e+01 : f32
    %299 = vector.broadcast %cst_104 : f32 to vector<8x1xf32>
    %300 = arith.divf %298, %299 : vector<8x1xf32>
    %301 = vector.broadcast %300 : vector<8x1xf32> to vector<8x32xf32>
    %302 = arith.subf %293, %301 : vector<8x32xf32>
    %303 = arith.mulf %302, %302 : vector<8x32xf32>
    %cst_105 = arith.constant dense<0.000000e+00> : vector<8xf32>
    %304 = vector.multi_reduction <add>, %303, %cst_105 [1] : vector<8x32xf32> to vector<8xf32>
    %305 = vector.shape_cast %304 : vector<8xf32> to vector<8x1xf32>
    %cst_106 = arith.constant 3.200000e+01 : f32
    %306 = vector.broadcast %cst_106 : f32 to vector<8x1xf32>
    %307 = arith.divf %305, %306 : vector<8x1xf32>
    %308 = vector.broadcast %300 : vector<8x1xf32> to vector<8x32xf32>
    %309 = arith.subf %293, %308 : vector<8x32xf32>
    %cst_107 = arith.constant 9.99999997E-7 : f32
    %310 = vector.broadcast %cst_107 : f32 to vector<8x1xf32>
    %311 = arith.addf %307, %310 : vector<8x1xf32>
    %312 = math.rsqrt %311 : vector<8x1xf32>
    %313 = vector.broadcast %312 : vector<8x1xf32> to vector<8x32xf32>
    %314 = arith.mulf %309, %313 : vector<8x32xf32>
    %315 = vector.broadcast %295 : vector<1x32xf32> to vector<8x32xf32>
    %316 = arith.mulf %314, %315 : vector<8x32xf32>
    %317 = vector.broadcast %296 : vector<1x32xf32> to vector<8x32xf32>
    %318 = arith.addf %316, %317 : vector<8x32xf32>
    %319 = vector.extract_strided_slice %318 {offsets = [0, 0], sizes = [1, 32], strides = [1, 1]} : vector<8x32xf32> to vector<1x32xf32>
    %320 = arith.truncf %319 : vector<1x32xf32> to vector<1x32xbf16>
    %c0_108 = arith.constant 0 : index
    %c0_109 = arith.constant 0 : index
    %321 = vector.load %arg12[%c0_108, %c0_109] : memref<32x128xbf16, #tpu.memory_space<vmem>>, vector<32x128xbf16>
    %cst_110 = arith.constant dense<0.000000e+00> : vector<1x128xf32>
    %322 = tpu.matmul %320, %321, %cst_110 {dimension_numbers = #tpu.dot_dimension_numbers<[1], [0], [0], [1], [0, 0, 1, 1], [], []>} : vector<1x32xbf16>, vector<32x128xbf16>, vector<1x128xf32> -> vector<1x128xf32>
    %c0_111 = arith.constant 0 : index
    %c0_112 = arith.constant 0 : index
    %323 = vector.load %arg13[%c0_111, %c0_112] : memref<1x128xf32, #tpu.memory_space<vmem>>, vector<1x128xf32>
    %324 = arith.addf %322, %323 : vector<1x128xf32>
    %325 = vector.shape_cast %324 : vector<1x128xf32> to vector<1x1x128xf32>
    %c0_113 = arith.constant 0 : index
    %c0_114 = arith.constant 0 : index
    %c0_115 = arith.constant 0 : index
    %326 = vector.load %arg14[%c0_113, %c0_114, %c0_115] : memref<1x1x128xf32, #tpu.memory_space<vmem>>, vector<1x1x128xf32>
    tpu.vector_store %arg14[%c0_113, %c0_114, %c0_115], %325 {strides = array<i32>} : memref<1x1x128xf32, #tpu.memory_space<vmem>>, vector<1x1x128xf32>,
    return
  }
  func.func @transform_0(%arg0: i32) -> (i32, i32, i32) {
    %c0_i32 = arith.constant 0 : i32
    %c0_i32_0 = arith.constant 0 : i32
    %c0_i32_1 = arith.constant 0 : i32
    return %arg0, %c0_i32, %c0_i32_0 : i32, i32, i32
  }
  func.func @transform_1(%arg0: i32) -> (i32, i32) {
    %c0_i32 = arith.constant 0 : i32
    %c0_i32_0 = arith.constant 0 : i32
    %c0_i32_1 = arith.constant 0 : i32
    return %c0_i32, %c0_i32_0 : i32, i32
  }
  func.func @transform_2(%arg0: i32) -> (i32, i32) {
    %c0_i32 = arith.constant 0 : i32
    %c0_i32_0 = arith.constant 0 : i32
    %c0_i32_1 = arith.constant 0 : i32
    return %c0_i32, %c0_i32_0 : i32, i32
  }
  func.func @transform_3(%arg0: i32) -> (i32, i32, i32, i32) {
    %c0_i32 = arith.constant 0 : i32
    %c0_i32_0 = arith.constant 0 : i32
    %c0_i32_1 = arith.constant 0 : i32
    %c0_i32_2 = arith.constant 0 : i32
    %c0_i32_3 = arith.constant 0 : i32
    return %c0_i32, %c0_i32_0, %c0_i32_1, %c0_i32_2 : i32, i32, i32, i32
  }
  func.func @transform_4(%arg0: i32) -> (i32, i32, i32) {
    %c0_i32 = arith.constant 0 : i32
    %c0_i32_0 = arith.constant 0 : i32
    %c0_i32_1 = arith.constant 0 : i32
    %c0_i32_2 = arith.constant 0 : i32
    return %c0_i32, %c0_i32_0, %c0_i32_1 : i32, i32, i32
  }
  func.func @transform_5(%arg0: i32) -> (i32, i32, i32) {
    %c0_i32 = arith.constant 0 : i32
    %c0_i32_0 = arith.constant 0 : i32
    %c0_i32_1 = arith.constant 0 : i32
    %c0_i32_2 = arith.constant 0 : i32
    return %c0_i32, %c0_i32_0, %c0_i32_1 : i32, i32, i32
  }
  func.func @transform_6(%arg0: i32) -> (i32, i32, i32) {
    %c0_i32 = arith.constant 0 : i32
    %c0_i32_0 = arith.constant 0 : i32
    %c0_i32_1 = arith.constant 0 : i32
    %c0_i32_2 = arith.constant 0 : i32
    return %c0_i32, %c0_i32_0, %c0_i32_1 : i32, i32, i32
  }
  func.func @transform_7(%arg0: i32) -> (i32, i32, i32) {
    %c0_i32 = arith.constant 0 : i32
    %c0_i32_0 = arith.constant 0 : i32
    %c0_i32_1 = arith.constant 0 : i32
    %c0_i32_2 = arith.constant 0 : i32
    return %c0_i32, %c0_i32_0, %c0_i32_1 : i32, i32, i32
  }
  func.func @transform_8(%arg0: i32) -> (i32, i32, i32) {
    %c0_i32 = arith.constant 0 : i32
    %c0_i32_0 = arith.constant 0 : i32
    %c0_i32_1 = arith.constant 0 : i32
    %c0_i32_2 = arith.constant 0 : i32
    return %c0_i32, %c0_i32_0, %c0_i32_1 : i32, i32, i32
  }
  func.func @transform_9(%arg0: i32) -> (i32, i32, i32) {
    %c0_i32 = arith.constant 0 : i32
    %c0_i32_0 = arith.constant 0 : i32
    %c0_i32_1 = arith.constant 0 : i32
    %c0_i32_2 = arith.constant 0 : i32
    return %c0_i32, %c0_i32_0, %c0_i32_1 : i32, i32, i32
  }
  func.func @transform_10(%arg0: i32) -> (i32, i32) {
    %c0_i32 = arith.constant 0 : i32
    %c0_i32_0 = arith.constant 0 : i32
    %c0_i32_1 = arith.constant 0 : i32
    return %c0_i32, %c0_i32_0 : i32, i32
  }
  func.func @transform_11(%arg0: i32) -> (i32, i32) {
    %c0_i32 = arith.constant 0 : i32
    %c0_i32_0 = arith.constant 0 : i32
    %c0_i32_1 = arith.constant 0 : i32
    return %c0_i32, %c0_i32_0 : i32, i32
  }
  func.func @transform_12(%arg0: i32) -> (i32, i32) {
    %c0_i32 = arith.constant 0 : i32
    %c0_i32_0 = arith.constant 0 : i32
    %c0_i32_1 = arith.constant 0 : i32
    return %c0_i32, %c0_i32_0 : i32, i32
  }
  func.func @transform_13(%arg0: i32) -> (i32, i32, i32) {
    %c0_i32 = arith.constant 0 : i32
    %c0_i32_0 = arith.constant 0 : i32
    %c0_i32_1 = arith.constant 0 : i32
    return %arg0, %c0_i32, %c0_i32_0 : i32, i32, i32
  }
}

</mosaic_0001>

<bundles_post_ra>
// kernel: vit_forward.1
= control target key start
LH: loop header
LB: loop body
LE: loop exit
PB: predicated region body
PF: predicated region fallthrough
CT: control target
= control target key end

     0   :  { %18 = vsyncpa [#allocation3], 0  ;;  %s5677_s0 = inlined_call_operand.vmem [shape: bf16[2,8,192], index: 0, kind: input, shape index: {}]   ;;  %s5678_s1 = inlined_call_operand.vmem [shape: bf16[192,32], index: 1, kind: input, shape index: {}]   ;;  %s5679_s2 = inlined_call_operand.vmem [shape: f32[8,32], index: 2, kind: input, shape index: {}]   ;;  %s5680_s3 = inlined_call_operand.vmem [shape: bf16[2,12,32,8], index: 3, kind: input, shape index: {}]   ;;  %s5681_s4 = inlined_call_operand.vmem [shape: f32[2,12,8], index: 4, kind: input, shape index: {}]   ;;  %s5682_s5 = inlined_call_operand.vmem [shape: bf16[2,32,32], index: 5, kind: input, shape index: {}]   ;;  %s5683_s6 = inlined_call_operand.vmem [shape: bf16[2,32,64], index: 6, kind: input, shape index: {}]   ;;  %s5684_s7 = inlined_call_operand.vmem [shape: bf16[2,64,32], index: 7, kind: input, shape index: {}]   ;;  %s5685_s8 = inlined_call_operand.vmem [shape: f32[2,6,32], index: 8, kind: input, shape index: {}]   ;;  %s5686_s9 = inlined_call_operand.vmem [shape: f32[2,1,64], index: 9, kind: input, shape index: {}]   ;;  %s5687_s10 = inlined_call_operand.vmem [shape: f32[2,32], index: 10, kind: input, shape index: {}]   ;;  %s5688_s11 = inlined_call_operand.vmem [shape: bf16[32,128], index: 11, kind: input, shape index: {}]   ;;  %s5689_s12 = inlined_call_operand.vmem [shape: f32[1,128], index: 12, kind: input, shape index: {}]   ;;  %s5690_s13 = inlined_call_operand.hbm [shape: f32[2,1,128], index: 13, kind: output, shape index: {}]  }
   0x1   :  { %20 = vsyncpa [#allocation3 + $0x1], 0  ;;  %s4833_s25 = smov 0   ;;  %s4835_s26 = smov 0  }
   0x2   :  { %s4837_s27 = smov 0   ;;  %s4839_s28 = smov 0  }
   0x3 LB: > { %5694 = sst [smem:[#allocation5_spill]] %s4748_s27  ;;  %s4854_s29 = sadd.s32 4294967295, %s4752_s28   ;;  %s4752_s28 = sphi %s4839_s28, %s5699_s28   ;;  %s4748_s27 = sphi %s4837_s27, %s5701_s27   ;;  %s4744_s26 = sphi %s4835_s26, %s5703_s26   ;;  %s4740_s25 = sphi %s4833_s25, %s5702_s25  }
   0x4   : > { %s3824_s30 = sadd.s32 4294967294, %s4752_s28   ;;  %s4858_s14 = sadd.s32 1, %s4752_s28  }
   0x5   : > { %5695 = sst [smem:[#allocation6_spill]] %s4858_s14  ;;  %s311_s15 = sadd.s32 1, %s4748_s27 }
   0x6   : > { %s308_s16 = ssub.s32 %s4752_s28, %s4858_s14  ;;  %p321_p0 = scmp.ne.s32.totalorder %s4748_s27, %s4744_s26 }
   0x7   : > { %p309_p1 = scmp.eq.s32.totalorder %s308_s16, 0  ;;  %p322_p2 = scmp.eq.s32.totalorder %s4854_s29, 1 }
   0x8   : > { %p327_p3 = scmp.ne.s32.totalorder %s4744_s26, %s4740_s25  ;;  %p328_p4 = scmp.eq.s32.totalorder %s3824_s30, 1 }
   0x9   : > { %s4869_s17 = scalar_select %p309_p1, %s4748_s27, %s311_s15  }
   0xa   : > { %p4871_p5 = por %p322_p2, %p321_p0  ;;  %p4875_p6 = por %p328_p4, %p327_p3 }
   0xb   : > { %5696 = sst [smem:[#allocation7_spill]] %s4869_s17  ;;  %p3827_p7 = scmp.ge.s32.totalorder %s4752_s28, 1 }
   0xc   : > { %p390_p8 = scmp.lt.s32.totalorder %s4752_s28, 3 }
   0xe   : > { %p391_p9 = pnand %p3827_p7, %p390_p8 }
   0xf   : > { %v4562_v0 = vld [vmem:[%s5678_s1] sm:$0xff] (!%p391_p9)   ;;  %v4754_v1 = vmov (!%p391_p9), 0   ;;  %p433_p10 = scmp.lt.s32.totalorder (!%p391_p9), %s4854_s29, 1  ;;  %v4563_v2 = vld [vmem:[%s5678_s1 + $0x8] sm:$0xff] (!%p391_p9)   ;;  %v4564_v3 = vld [vmem:[%s5678_s1 + $0x10] sm:$0xff] (!%p391_p9)   ;;  %vm543_vm0 = vcmask (!%p391_p9), 523264   ;;  %v587_v35 = vlaneseq (!%p391_p9) }
  0x10   : > { %394 = sbr.rel (%p391_p9) target bundleno = 5680 (0x1630), region = 72  ;;  %547 = vmatprep.subr.bf16.mxu0 (!%p391_p9), %v4754_v1  ;;  %v4565_v4 = vld [vmem:[%s5678_s1 + $0x18] sm:$0xff] (!%p391_p9)   ;;  %v4566_v5 = vld [vmem:[%s5678_s1 + $0x20] sm:$0xff] (!%p391_p9)   ;;  %v4567_v8 = vld [vmem:[%s5678_s1 + $0x28] sm:$0xff] (!%p391_p9)   ;;  %vm659_vm1 = vcmask (!%p391_p9), 261120   ;;  %v4755_v30 = vmov (!%p391_p9), 0.0  }
  0x11   : > { %548 = vmatpush1.bf16.msra.mxu0 (!%p391_p9), %v4562_v0  ;;  %v4568_v9 = vld [vmem:[%s5678_s1 + $0x30] sm:$0xff] (!%p391_p9)   ;;  %v4569_v10 = vld [vmem:[%s5678_s1 + $0x38] sm:$0xff] (!%p391_p9)   ;;  %v4570_v11 = vld [vmem:[%s5678_s1 + $0x40] sm:$0xff] (!%p391_p9)   ;;  %4163 = vmatprep.subr.bf16.mxu1 (!%p391_p9), %v4755_v30  ;;  %vm4756_vm2 = vmmov (!%p391_p9), 0   ;;  %v4955_v37 = vshrl.u32 (!%p391_p9), %v587_v35, 7  ;;  %vm1459_vm3 = vcmask (!%p391_p9), 64512  }
  0x12   : > { %549 = vmatprep.subr.bf16.mxu0 (!%p391_p9), %v4754_v1  ;;  %v4571_v12 = vld [vmem:[%s5678_s1 + $0x48] sm:$0xff] (!%p391_p9)   ;;  %v4572_v13 = vld [vmem:[%s5678_s1 + $0x50] sm:$0xff] (!%p391_p9)   ;;  %v4573_v14 = vld [vmem:[%s5678_s1 + $0x58] sm:$0xff] (!%p391_p9)   ;;  %4167 = vmatprep.mubr.msk.bf16.mxu1 (!%p391_p9), %vm4756_vm2, %v4755_v30  ;;  %vm1703_vm4 = vcmask (!%p391_p9), 1043456   ;;  %s4759_s21 = smov (!%p391_p9), 16   ;;  %s4760_s22 = smov (!%p391_p9), 8  }
  0x13   : > { %v464_v16 = vld [vmem:[%s5679_s2] sm:$0xff] (!%p391_p9)  ;;  %v4578_v31 = vld [vmem:[%s5680_s3 + $0x8] sm:$0xff] (!%p391_p9)   ;;  %v4958_v38 = vsub.s32 (!%p391_p9), 0, %v4955_v37  ;;  %v4966_v40 = vsub.s32 (!%p391_p9), 1, %v4955_v37  ;;  %v4580_v47 = vld [vmem:[%s5680_s3 + $0x10] sm:$0xff] (!%p391_p9)   ;;  %s4761_s23 = smov (!%p391_p9), 24  }
  0x14   : > { %v4576_v28 = vld [vmem:[%s5680_s3] sm:$0xff] (!%p391_p9)   ;;  %v4579_v32 = vld [vmem:[%s5680_s3 + $0x68] sm:$0xff] (!%p391_p9)   ;;  %v4582_v50 = vld [vmem:[%s5680_s3 + $0x18] sm:$0xff] (!%p391_p9)   ;;  %vm1898_vm6 = vcmask (!%p391_p9), 130048   ;;  %vm1900_vm7 = vcmask (!%p391_p9), 195584  }
  0x15   : > { %550 = vmatpush1.bf16.msra.mxu0 (!%p391_p9), %v4563_v2  ;;  %v4577_v29 = vld [vmem:[%s5680_s3 + $0x60] sm:$0xff] (!%p391_p9)   ;;  %4164 = vmatpush3.bf16.msra.mxu1 (!%p391_p9), %v4576_v28  ;;  %v4583_v51 = vld [vmem:[%s5680_s3 + $0x88] sm:$0xff] (!%p391_p9)   ;;  %v4588_v56 = vld [vmem:[%s5680_s3 + $0x30] sm:$0xff] (!%p391_p9)  }
  0x16   : > { %551 = vmatprep.subr.bf16.mxu0 (!%p391_p9), %v4754_v1  ;;  %4165 = vmatprep.subr.bf16.mxu1 (!%p391_p9), %v4755_v30  ;;  %v4963_v39 = vld [vmem:[%s5685_s8] sm:$0x3f] (!%p391_p9)  ;;  %v4586_v54 = vld [vmem:[%s5680_s3 + $0x28] sm:$0xff] (!%p391_p9)   ;;  %v4589_v57 = vld [vmem:[%s5680_s3 + $0x38] sm:$0xff] (!%p391_p9)  }
  0x17   : > { %s434_s24 = scalar_select %p433_p10, %s4854_s29, 1  ;;  %v677_v41 = vrot.slane %v4963_v39, %v4958_v38  ;;  %v682_v43 = vrot.slane %v4963_v39, %v4966_v40  ;;  %v4581_v48 = vld [vmem:[%s5680_s3 + $0x80] sm:$0xff]   ;;  %v4587_v55 = vld [vmem:[%s5680_s3 + $0xa8] sm:$0xff]   ;;  %v4592_v60 = vld [vmem:[%s5680_s3 + $0x50] sm:$0xff]  }
  0x18   : > { %v4584_v52 = vld [vmem:[%s5680_s3 + $0x20] sm:$0xff]   ;;  %v4591_v59 = vld [vmem:[%s5680_s3 + $0x48] sm:$0xff]   ;;  %v4593_v61 = vld [vmem:[%s5680_s3 + $0x58] sm:$0xff]  }
  0x19   : > { %s4033_s16 = sshll.u32 %s434_s24, 3  ;;  %552 = vmatpush1.bf16.msra.mxu0 %v4564_v3  ;;  %4166 = vmatpush3.bf16.msra.mxu1 %v4578_v31  ;;  %v4585_v53 = vld [vmem:[%s5680_s3 + $0xa0] sm:$0xff]   ;;  %v4594_v62 = vld [vmem:[%s5680_s3 + $0x70] sm:$0xff]   ;;  %v4595_v63 = vld [vmem:[%s5680_s3 + $0x78] sm:$0xff]  }
  0x1a   : > { %s437_s17 = scalar_lea.vmem %s5677_s0, %s4033_s16  ;;  %553 = vmatprep.subr.bf16.mxu0 %v4754_v1  ;;  %4171 = vmatprep.subr.bf16.mxu1 %v4755_v30  ;;  %v4590_v58 = vld [vmem:[%s5680_s3 + $0x40] sm:$0xff]   ;;  %v4596_v0 = vld [vmem:[%s5680_s3 + $0x90] sm:$0xff]   ;;  %v4599_v3 = vld [vmem:[%s5680_s3 + $0xb8] sm:$0xff]   ;;  %s431_s16 = sand.u32 1, %s4744_s26  }
  0x1b   : > { %v439_v6 = vld [vmem:[%s437_s17] sm:$0xff]  ;;  %v4598_v2 = vld [vmem:[%s5680_s3 + $0xb0] sm:$0xff]   ;;  %s3757_s15 = scalar_lea.sflag [#allocation3], %s431_s16  ;;  %s4762_s17 = smov [#allocation2]  }
  0x1c   : > { %v3831_v7 = vcombine.high %v439_v6, %v439_v6  ;;  %v3830_v15 = vcombine.low %v439_v6, %v439_v6  ;;  %s4694_s20 = sshll.u32 %s4762_s17, 4  ;;  %s4695_s20 = int_to_ptr.vmem [resolvable:$false] %s4694_s20 }
  0x1d   : > { %554 = vmatpush1.bf16.msra.mxu0 %v4565_v4  ;;  %v4757_v4 = vmov 1966171168  }
  0x1e   : > { %555 = vmatprep.subr.bf16.mxu0 %v4754_v1  ;;  %3844 = vmatprep.mubr.msk.bf16.mxu0 %vm543_vm0, %v3831_v7 }
  0x21   : > { %556 = vmatpush1.bf16.msra.mxu0 %v4566_v5  ;;  %v687_v5 = vunpack.c.l.s4 %v4757_v4 }
  0x22   : > { %557 = vmatprep.subr.bf16.mxu0 %v4754_v1 }
  0x25   : > { %558 = vmatpush1.bf16.msra.mxu0 %v4567_v8  ;;  %v688_v8 = vunpack.c.0.s8 %v687_v5 }
  0x26   : > { %559 = vmatprep.subr.bf16.mxu0 %v4754_v1 }
  0x29   : > { %560 = vmatpush1.bf16.msra.mxu0 %v4568_v9 }
  0x2a   : > { %561 = vmatprep.subr.bf16.mxu0 %v4754_v1 }
  0x2d   : > { %562 = vmatpush1.bf16.msra.mxu0 %v4569_v10 }
  0x2e   : > { %563 = vmatprep.subr.bf16.mxu0 %v4754_v1 }
  0x31   : > { %564 = vmatpush1.bf16.msra.mxu0 %v4570_v11 }
  0x32   : > { %565 = vmatprep.subr.bf16.mxu0 %v4754_v1 }
  0x35   : > { %566 = vmatpush1.bf16.msra.mxu0 %v4571_v12 }
  0x36   : > { %567 = vmatprep.subr.bf16.mxu0 %v4754_v1 }
  0x39   : > { %568 = vmatpush1.bf16.msra.mxu0 %v4572_v13 }
  0x3a   : > { %569 = vmatprep.subr.bf16.mxu0 %v4754_v1  ;;  %v4597_v1 = vld [vmem:[%s5680_s3 + $0x98] sm:$0xff]  }
  0x3d   : > { %570 = vmatpush1.bf16.msra.mxu0 %v4573_v14 }
  0x3e   : > { %4211 = vmatprep.subr.bf16.mxu0 %v4755_v30 }
  0x40   : > { %580 = vmatmul.mubr.bf16.vlgmr.msra.gmra.mrb[0].mxu0 %v3830_v15  ;;  %v5105_v15 = vld.sshfl [vmem:[%s5681_s4 + $0x8] sm:$0x33 pattern:$0x75316420] }
  0x41   : > { %4212 = vmatpush3.bf16.msra.mxu0 %v4577_v29  ;;  %4215 = vmatprep.mubr.msk.bf16.mxu0 %vm4756_vm2, %v4755_v30  ;;  %v639_v29 = vld [vmem:[%s5681_s4] sm:$0xff] }
  0x42   : > { %4213 = vmatprep.subr.bf16.mxu0 %v4755_v30 }
  0x45   : > { %4214 = vmatpush3.bf16.msra.mxu0 %v4579_v32 }
  0x46   : > { %4227 = vmatprep.subr.bf16.mxu0 %v4755_v30 }
 0x113   : > { %v581_v17 = vpop.f32.mrb[0].mxu0 }
 0x114   : > { %v4926_v18 = vadd.f32 %v581_v17, %v464_v16  ;;  %v583_v19 = vpop.f32.mrb[1].mxu0  ;;  %v5108_v16 = vsub.s32 %v688_v8, %v4955_v37 }
 0x115   : > { %v584_v20 = vpop.f32.mrb[2].mxu0 }
 0x116   : > { %v585_v21 = vpop.f32.mrb[3].mxu0  ;;  %v660_v22 = vsel %vm659_vm1, %v4926_v18, 0.0  ;;  %v5112_v17 = vrot.slane %v5105_v15, %v5108_v16 }
 0x117   : > { %661 = vadd.xlane.f32.xlu0 %v660_v22 }
 0x1a4   : > { %v662_v23 = vpop.xlane.xlu0 %661 }
 0x1a5   : > { %v664_v24 = vmul.f32 0.03125, %v662_v23  ;;  %v1217_v23 = vcombine.high %v5112_v17, %v5112_v17 }
 0x1a7   : > { %v665_v25 = vsub.f32 %v4926_v18, %v664_v24  ;;  %v1230_v28 = vrot.slane %v1217_v23, %v4958_v38 }
 0x1a9   : > { %v666_v26 = vmul.f32 %v665_v25, %v665_v25 }
 0x1ab   : > { %v667_v27 = vsel %vm659_vm1, %v666_v26, 0.0 }
 0x1ac   : > { %668 = vadd.xlane.f32.xlu0 %v667_v27 }
 0x239   : > { %v669_v33 = vpop.xlane.xlu0 %668 }
 0x23a   : > { %v670_v34 = vmul.f32 0.03125, %v669_v33  ;;  %v941_v33 = vcombine.high %v639_v29, %v639_v29 }
 0x23c   : > { %v671_v36 = vadd.f32 1e-06, %v670_v34 }
 0x23e   : > { %4644 = vrsqrt.f32 %v671_v36 }
 0x248   : > { %v4645_v42 = vpop.eup %4644 }
 0x249   : > { %v673_v44 = vmul.f32 %v4645_v42, %v665_v25 }
 0x24b   : > { %v678_v45 = vmul.f32 %v677_v41, %v673_v44 }
 0x24d   : > { %v683_v46 = vadd.f32 %v682_v43, %v678_v45 }
 0x24f   : > { %v4978_v49 = vpack.c.bf16 %v683_v46, %v683_v46  ;;  %v948_v46 = vrot.slane %v941_v33, %v5108_v16 }
 0x251   : > { %4168 = vmatmul.mubr.msk.bf16.vlgmr.msra.gmra.mrb[0].mxu1 %vm659_vm1, %v4978_v49  ;;  %4216 = vmatmul.mubr.msk.bf16.vlgmr.msra.gmra.mrb[4].mxu0 %vm659_vm1, %v4978_v49 }
 0x252   : > { %4172 = vmatpush3.bf16.msra.mxu1 %v4580_v47  ;;  %4228 = vmatpush3.bf16.msra.mxu0 %v4581_v48  ;;  %v956_v48 = vrot.slane %v948_v46, %v5108_v16 }
 0x253   : > { %4173 = vmatprep.subr.bf16.mxu1 %v4755_v30  ;;  %4229 = vmatprep.subr.bf16.mxu0 %v4755_v30 }
 0x254   : > { %4175 = vmatprep.mubr.msk.bf16.mxu1 %vm4756_vm2, %v4755_v30  ;;  %4231 = vmatprep.mubr.msk.bf16.mxu0 %vm4756_vm2, %v4755_v30 }
 0x256   : > { %4174 = vmatpush3.bf16.msra.mxu1 %v4582_v50  ;;  %4230 = vmatpush3.bf16.msra.mxu0 %v4583_v51  ;;  %v692_v51 = vrot.slane %v639_v29, %v5108_v16 }
 0x257   : > { %4179 = vmatprep.subr.bf16.mxu1 %v4755_v30  ;;  %4243 = vmatprep.subr.bf16.mxu0 %v4755_v30 }
 0x259   : > { %4176 = vmatmul.mubr.msk.bf16.vlgmr.msra.gmra.mrb[4].mxu1 %vm659_vm1, %v4978_v49  ;;  %4232 = vmatmul.mubr.msk.bf16.vlgmr.msra.gmra.mrb[8].mxu0 %vm659_vm1, %v4978_v49 }
 0x25a   : > { %4180 = vmatpush3.bf16.msra.mxu1 %v4584_v52  ;;  %4244 = vmatpush3.bf16.msra.mxu0 %v4585_v53  ;;  %v964_v53 = vcombine.high %v956_v48, %v956_v48 }
 0x25b   : > { %4181 = vmatprep.subr.bf16.mxu1 %v4755_v30  ;;  %4245 = vmatprep.subr.bf16.mxu0 %v4755_v30 }
 0x25c   : > { %4183 = vmatprep.mubr.msk.bf16.mxu1 %vm4756_vm2, %v4755_v30  ;;  %4247 = vmatprep.mubr.msk.bf16.mxu0 %vm4756_vm2, %v4755_v30 }
 0x25e   : > { %4182 = vmatpush3.bf16.msra.mxu1 %v4586_v54  ;;  %4246 = vmatpush3.bf16.msra.mxu0 %v4587_v55  ;;  %v969_v54 = vrot.slane %v956_v48, %v4958_v38  ;;  %v949_v55 = vcombine.high %v948_v46, %v948_v46 }
 0x25f   : > { %4187 = vmatprep.subr.bf16.mxu1 %v4755_v30  ;;  %4259 = vmatprep.subr.bf16.mxu0 %v4755_v30 }
 0x261   : > { %4184 = vmatmul.mubr.msk.bf16.vlgmr.msra.gmra.mrb[8].mxu1 %vm659_vm1, %v4978_v49  ;;  %4248 = vmatmul.mubr.msk.bf16.vlgmr.msra.gmra.mrb[12].mxu0 %vm659_vm1, %v4978_v49 }
 0x262   : > { %4188 = vmatpush3.bf16.msra.mxu1 %v4588_v56  ;;  %4191 = vmatprep.mubr.msk.bf16.mxu1 %vm4756_vm2, %v4755_v30  ;;  %v700_v56 = vrot.slane %v692_v51, %v5108_v16 }
 0x263   : > { %4189 = vmatprep.subr.bf16.mxu1 %v4755_v30  ;;  %4261 = vmatprep.mubr.msk.bf16.mxu0 %vm4756_vm2, %v4755_v30 }
 0x266   : > { %4190 = vmatpush3.bf16.msra.mxu1 %v4589_v57 }
 0x267   : > { %4195 = vmatprep.subr.bf16.mxu1 %v4755_v30 }
 0x269   : > { %4192 = vmatmul.mubr.msk.bf16.vlgmr.msra.gmra.mrb[12].mxu1 %vm659_vm1, %v4978_v49 }
 0x26a   : > { %4196 = vmatpush3.bf16.msra.mxu1 %v4590_v58  ;;  %4199 = vmatprep.mubr.msk.bf16.mxu1 %vm4756_vm2, %v4755_v30  ;;  %v977_v58 = vrot.slane %v964_v53, %v4958_v38 }
 0x26b   : > { %4197 = vmatprep.subr.bf16.mxu1 %v4755_v30 }
 0x26e   : > { %4198 = vmatpush3.bf16.msra.mxu1 %v4591_v59 }
 0x26f   : > { %4203 = vmatprep.subr.bf16.mxu1 %v4755_v30 }
 0x271   : > { %4200 = vmatmul.mubr.msk.bf16.vlgmr.msra.gmra.mrb[16].mxu1 %vm659_vm1, %v4978_v49 }
 0x272   : > { %4204 = vmatpush3.bf16.msra.mxu1 %v4592_v60  ;;  %4207 = vmatprep.mubr.msk.bf16.mxu1 %vm4756_vm2, %v4755_v30 }
 0x273   : > { %4205 = vmatprep.subr.bf16.mxu1 %v4755_v30 }
 0x276   : > { %4206 = vmatpush3.bf16.msra.mxu1 %v4593_v61  ;;  %v963_v61 = vrot.slane %v949_v55, %v5108_v16 }
 0x277   : > { %4219 = vmatprep.subr.bf16.mxu1 %v4755_v30 }
 0x278   : > { %v973_v5 = vrot.slane %v963_v61, %v4958_v38 }
 0x279   : > { %4208 = vmatmul.mubr.msk.bf16.vlgmr.msra.gmra.mrb[20].mxu1 %vm659_vm1, %v4978_v49 }
 0x27a   : > { %4220 = vmatpush3.bf16.msra.mxu1 %v4594_v62  ;;  %4223 = vmatprep.mubr.msk.bf16.mxu1 %vm4756_vm2, %v4755_v30 }
 0x27b   : > { %4221 = vmatprep.subr.bf16.mxu1 %v4755_v30 }
 0x27e   : > { %4222 = vmatpush3.bf16.msra.mxu1 %v4595_v63  ;;  %v713_v63 = vrot.slane %v700_v56, %v4958_v38 }
 0x27f   : > { %4235 = vmatprep.subr.bf16.mxu1 %v4755_v30 }
 0x281   : > { %4224 = vmatmul.mubr.msk.bf16.vlgmr.msra.gmra.mrb[24].mxu1 %vm659_vm1, %v4978_v49 }
 0x282   : > { %4236 = vmatpush3.bf16.msra.mxu1 %v4596_v0  ;;  %4239 = vmatprep.mubr.msk.bf16.mxu1 %vm4756_vm2, %v4755_v30  ;;  %v693_v0 = vcombine.high %v692_v51, %v692_v51 }
 0x283   : > { %4237 = vmatprep.subr.bf16.mxu1 %v4755_v30 }
 0x286   : > { %4238 = vmatpush3.bf16.msra.mxu1 %v4597_v1 }
 0x287   : > { %4251 = vmatprep.subr.bf16.mxu1 %v4755_v30 }
 0x289   : > { %4240 = vmatmul.mubr.msk.bf16.vlgmr.msra.gmra.mrb[28].mxu1 %vm659_vm1, %v4978_v49 }
 0x28a   : > { %4252 = vmatpush3.bf16.msra.mxu1 %v4598_v2  ;;  %4255 = vmatprep.mubr.msk.bf16.mxu1 %vm4756_vm2, %v4755_v30 }
 0x28b   : > { %4253 = vmatprep.subr.bf16.mxu1 %v4755_v30 }
 0x28e   : > { %4254 = vmatpush3.bf16.msra.mxu1 %v4599_v3 }
 0x28f   : > { %4265 = vmatprep.subr.bf16.mxu1 %v4755_v30 }
 0x291   : > { %4256 = vmatmul.mubr.msk.bf16.vlgmr.msra.gmra.mrb[32].mxu1 %vm659_vm1, %v4978_v49 }
 0x292   : > { %4267 = vmatprep.mubr.msk.bf16.mxu1 %vm4756_vm2, %v4755_v30 }
 0x324   : > { %v779_v6 = vpop.f32.mrb[0].mxu1  ;;  %v1136_v7 = vpop.f32.mrb[4].mxu0 }
 0x325   : > { %v4169_v9 = vpop.f32.mrb[1].mxu1  ;;  %v4217_v10 = vpop.f32.mrb[5].mxu0  ;;  %v1137_v3 = vadd.f32 %v1136_v7, %v977_v58  ;;  %v780_v8 = vadd.f32 %v779_v6, %v713_v63 }
 0x326   : > { %v782_v11 = vpop.f32.mrb[2].mxu1  ;;  %v1139_v12 = vpop.f32.mrb[6].mxu0  ;;  %v707_v9 = vrot.slane %v693_v0, %v5108_v16  ;;  %v708_v10 = vcombine.high %v700_v56, %v700_v56 }
 0x327   : > { %v4170_v13 = vpop.f32.mrb[3].mxu1  ;;  %v4218_v14 = vpop.f32.mrb[7].mxu0  ;;  %v965_v12 = vcombine.high %v963_v61, %v963_v61  ;;  %v1447_v23 = vpack.c.bf16 %v780_v8, %v780_v8  ;;  %v4758_v8 = vmov -1e+30  }
 0x328   : > { %v1453_v13 = vpack.c.bf16 %v1137_v3, %v1137_v3  ;;  %v1222_v14 = vrot.slane %v5112_v17, %v4958_v38  ;;  %v1202_v17 = vcombine.high %v5105_v15, %v5105_v15 }
 0x32c   : > { %v5114_v19 = vpop.f32.mrb[4].mxu1  ;;  %v5116_v20 = vpop.f32.mrb[8].mxu0 }
 0x32d   : > { %v4177_v21 = vpop.f32.mrb[5].mxu1  ;;  %v4233_v22 = vpop.f32.mrb[9].mxu0  ;;  %v1286_v29 = vadd.f32 %v5116_v20, %v1222_v14 }
 0x32e   : > { %v834_v24 = vpop.f32.mrb[6].mxu1  ;;  %v1288_v25 = vpop.f32.mrb[10].mxu0 }
 0x32f   : > { %v4178_v26 = vpop.f32.mrb[7].mxu1  ;;  %v4234_v27 = vpop.f32.mrb[11].mxu0  ;;  %v717_v24 = vrot.slane %v707_v9, %v4958_v38  ;;  %v721_v25 = vrot.slane %v708_v10, %v4958_v38  ;;  %v1455_v20 = vpack.c.bf16 %v1286_v29, %v1286_v29 }
 0x330   : > { %v981_v27 = vrot.slane %v965_v12, %v4958_v38 }
 0x331   : > { %v832_v33 = vadd.f32 %v5114_v19, %v717_v24 }
 0x333   : > { %v1448_v46 = vpack.c.bf16 %v832_v33, %v832_v33 }
 0x334   : > { %v883_v31 = vpop.f32.mrb[8].mxu1  ;;  %v1389_v32 = vpop.f32.mrb[12].mxu0 }
 0x335   : > { %v5124_v34 = vadd.f32 %v1389_v32, %v1230_v28  ;;  %v4185_v36 = vpop.f32.mrb[9].mxu1  ;;  %v4249_v41 = vpop.f32.mrb[13].mxu0  ;;  %v1556_v28 = vsel %vm1459_vm3, %v1453_v13, 0 }
 0x336   : > { %v886_v42 = vpop.f32.mrb[10].mxu1  ;;  %v1392_v43 = vpop.f32.mrb[14].mxu0  ;;  %v884_v36 = vadd.f32 %v883_v31, %v721_v25  ;;  %v709_v41 = vcombine.high %v707_v9, %v707_v9 }
 0x337   : > { %v4186_v44 = vpop.f32.mrb[11].mxu1  ;;  %v4250_v45 = vpop.f32.mrb[15].mxu0 }
 0x338   : > { %v1216_v45 = vrot.slane %v1202_v17, %v5108_v16  ;;  %v1449_v48 = vpack.c.bf16 %v884_v36, %v884_v36  ;;  %v725_v19 = vrot.slane %v709_v41, %v4958_v38 }
 0x33c   : > { %v5127_v47 = vpop.f32.mrb[12].mxu1 }
 0x33d   : > { %v4193_v49 = vpop.f32.mrb[13].mxu1  ;;  %v936_v53 = vadd.f32 %v5127_v47, %v725_v19 }
 0x33e   : > { %v938_v50 = vpop.f32.mrb[14].mxu1 }
 0x33f   : > { %v4194_v52 = vpop.f32.mrb[15].mxu1  ;;  %v1705_v50 = vsel %vm1703_vm4, %v1455_v20, 0 }
 0x340   : > { %v1226_v52 = vrot.slane %v1216_v45, %v4958_v38 }
 0x344   : > { %v1032_v57 = vpop.f32.mrb[16].mxu1 }
 0x345   : > { %v1033_v59 = vadd.f32 %v1032_v57, %v969_v54  ;;  %v4201_v60 = vpop.f32.mrb[17].mxu1  ;;  %v1218_v57 = vcombine.high %v1216_v45, %v1216_v45 }
 0x346   : > { %v1035_v62 = vpop.f32.mrb[18].mxu1 }
 0x347   : > { %v1451_v1 = vpack.c.bf16 %v1033_v59, %v1033_v59  ;;  %v4202_v2 = vpop.f32.mrb[19].mxu1  ;;  %v1450_v59 = vpack.c.bf16 %v936_v53, %v936_v53  ;;  %v1234_v62 = vrot.slane %v1218_v57, %v4958_v38 }
 0x349   : > { %v1464_v4 = vsel %vm1459_vm3, %v1451_v1, 0 }
 0x34a   : > { %4260 = vmatpush3.bf16.xpose.msra.mxu0 %v1464_v4  ;;  %v588_v4 = vand.u32 127, %v587_v35 }
 0x34b   : > { %4271 = vmatprep.subr.bf16.mxu0 %v4755_v30 }
 0x34c   : > { %v1084_v11 = vpop.f32.mrb[20].mxu1  ;;  %vm589_vm5 = vcmp.lt.s32.totalorder %v588_v4, 5  ;;  %v1457_v4 = vpack.c.bf16 %v5124_v34, %v5124_v34 }
 0x34d   : > { %v1085_v21 = vadd.f32 %v1084_v11, %v973_v5  ;;  %v4209_v22 = vpop.f32.mrb[21].mxu1  ;;  %v5179_v9 = vsel %vm589_vm5, 0.0, %v4758_v8 }
 0x34e   : > { %v1087_v7 = vpop.f32.mrb[22].mxu1 }
 0x34f   : > { %v1452_v6 = vpack.c.bf16 %v1085_v21, %v1085_v21  ;;  %v4210_v26 = vpop.f32.mrb[23].mxu1 }
 0x351   : > { %v1510_v32 = vsel %vm1459_vm3, %v1452_v6, 0  ;;  %4262 = vmatmul.mubr.msk.bf16.vlgmr.msra.gmra.mrb[16].mxu0 %vm1459_vm3, %v1447_v23 }
 0x352   : > { %4266 = vmatpush3.bf16.xpose.msra.mxu1 %v1510_v32  ;;  %4272 = vmatpush3.bf16.xpose.msra.mxu0 %v1556_v28 }
 0x353   : > { %4273 = vmatprep.mubr.msk.bf16.mxu0 %vm4756_vm2, %v4755_v30  ;;  %4277 = vmatprep.subr.bf16.mxu1 %v4755_v30 }
 0x354   : > { %v1188_v42 = vpop.f32.mrb[24].mxu1  ;;  %4283 = vmatprep.subr.bf16.mxu0 %v4755_v30 }
 0x355   : > { %v1189_v43 = vadd.f32 %v1188_v42, %v981_v27  ;;  %v4225_v44 = vpop.f32.mrb[25].mxu1 }
 0x356   : > { %v1191_v15 = vpop.f32.mrb[26].mxu1 }
 0x357   : > { %v1454_v31 = vpack.c.bf16 %v1189_v43, %v1189_v43  ;;  %v4226_v49 = vpop.f32.mrb[27].mxu1 }
 0x359   : > { %v1602_v51 = vsel %vm1459_vm3, %v1454_v31, 0  ;;  %4268 = vmatmul.mubr.msk.bf16.vlgmr.msra.gmra.mrb[36].mxu1 %vm1459_vm3, %v1448_v46  ;;  %4274 = vmatmul.mubr.msk.bf16.vlgmr.msra.gmra.mrb[20].mxu0 %vm1459_vm3, %v1449_v48 }
 0x35a   : > { %4278 = vmatpush3.bf16.xpose.msra.mxu1 %v1602_v51  ;;  %4284 = vmatpush3.bf16.msra.mxu0 %v1705_v50 }
 0x35b   : > { %4279 = vmatprep.mubr.msk.bf16.mxu1 %vm4756_vm2, %v4755_v30  ;;  %4289 = vmatprep.subr.bf16.mxu1 %v4755_v30 }
 0x35c   : > { %v1337_v54 = vpop.f32.mrb[28].mxu1  ;;  %4285 = vmatprep.mubr.msk.bf16.mxu0 %vm4756_vm2, %v4755_v30  ;;  %4295 = vmatprep.subr.bf16.mxu0 %v4755_v30 }
 0x35d   : > { %v1338_v55 = vadd.f32 %v1337_v54, %v1226_v52  ;;  %v4241_v56 = vpop.f32.mrb[29].mxu1 }
 0x35e   : > { %v1340_v58 = vpop.f32.mrb[30].mxu1 }
 0x35f   : > { %v1456_v60 = vpack.c.bf16 %v1338_v55, %v1338_v55  ;;  %v4242_v61 = vpop.f32.mrb[31].mxu1 }
 0x361   : > { %v1751_v47 = vsel %vm1703_vm4, %v1456_v60, 0  ;;  %4280 = vmatmul.mubr.msk.bf16.vlgmr.msra.gmra.mrb[40].mxu1 %vm1459_vm3, %v1450_v59 }
 0x362   : > { %4290 = vmatpush3.bf16.msra.mxu1 %v1751_v47  ;;  %4291 = vmatprep.mubr.msk.bf16.mxu1 %vm4756_vm2, %v4755_v30 }
 0x363   : > { %4301 = vmatprep.subr.bf16.mxu1 %v4755_v30 }
 0x364   : > { %v1441_v63 = vpop.f32.mrb[32].mxu1 }
 0x365   : > { %v5176_v0 = vadd.f32 %v1441_v63, %v1234_v62  ;;  %v4257_v1 = vpop.f32.mrb[33].mxu1 }
 0x366   : > { %v1444_v2 = vpop.f32.mrb[34].mxu1 }
 0x367   : > { %v4258_v3 = vpop.f32.mrb[35].mxu1  ;;  %v1458_v34 = vpack.c.bf16 %v5176_v0, %v5176_v0 }
 0x424   : > { %v1500_v5 = vpop.f32.mrb[16].mxu0 }
 0x425   : > { %v1644_v10 = vmul.f32 0.35355338, %v1500_v5  ;;  %v4263_v11 = vpop.f32.mrb[17].mxu0 }
 0x426   : > { %v1503_v12 = vpop.f32.mrb[18].mxu0 }
 0x427   : > { %v4264_v13 = vpop.f32.mrb[19].mxu0  ;;  %v1648_v14 = vadd.f32 %v1644_v10, %v5179_v9  ;;  %v1797_v10 = vsel %vm1703_vm4, %v1457_v4, 0 }
 0x429   : > { %v1652_v21 = vsel %vm1459_vm3, %v1648_v14, -inf }
 0x42a   : > { %1653 = vmax.xlane.f32.xlu1 %v1652_v21 }
 0x42c   : > { %v1546_v22 = vpop.f32.mrb[36].mxu1  ;;  %v1592_v7 = vpop.f32.mrb[20].mxu0 }
 0x42d   : > { %v1645_v23 = vmul.f32 0.35355338, %v1546_v22  ;;  %v1646_v24 = vmul.f32 0.35355338, %v1592_v7  ;;  %v4269_v25 = vpop.f32.mrb[37].mxu1  ;;  %v4275_v35 = vpop.f32.mrb[21].mxu0 }
 0x42e   : > { %v1549_v6 = vpop.f32.mrb[38].mxu1  ;;  %v1595_v26 = vpop.f32.mrb[22].mxu0  ;;  %v4601_v35 = vld [vmem:[%s5682_s5] sm:$0xff]  }
 0x42f   : > { %v4270_v27 = vpop.f32.mrb[39].mxu1  ;;  %v4276_v28 = vpop.f32.mrb[23].mxu0  ;;  %v1650_v29 = vadd.f32 %v1646_v24, %v5179_v9  ;;  %v1649_v32 = vadd.f32 %v1645_v23, %v5179_v9  ;;  %v1843_v23 = vsel %vm1703_vm4, %v1458_v34, 0 }
 0x431   : > { %v1658_v17 = vsel %vm1459_vm3, %v1650_v29, -inf  ;;  %v1655_v33 = vsel %vm1459_vm3, %v1649_v32, -inf }
 0x432   : > { %1659 = vmax.xlane.f32.xlu0 %v1658_v17  ;;  %1656 = vmax.xlane.f32.xlu1 %v1655_v33 }
 0x434   : > { %v1638_v36 = vpop.f32.mrb[40].mxu1 }
 0x435   : > { %v1647_v41 = vmul.f32 0.35355338, %v1638_v36  ;;  %v4281_v42 = vpop.f32.mrb[41].mxu1 }
 0x436   : > { %v1641_v20 = vpop.f32.mrb[42].mxu1 }
 0x437   : > { %v4282_v43 = vpop.f32.mrb[43].mxu1  ;;  %v1651_v44 = vadd.f32 %v1647_v41, %v5179_v9 }
 0x439   : > { %v1661_v45 = vsel %vm1459_vm3, %v1651_v44, -inf }
 0x43a   : > { %1662 = vmax.xlane.f32.xlu1 %v1661_v45 }
 0x4b7   : > { %v1654_v15 = vpop.xlane.xlu1 %1653 }
 0x4b8   : > { %v1664_v46 = vsub.f32 %v1648_v14, %v1654_v15 }
 0x4ba   : > { %v1668_v48 = vmul.f32 1.442695, %v1664_v46 }
 0x4bc   : > { %4646 = vpow2.f32 %v1668_v48 }
 0x4bf   : > { %v1660_v19 = vpop.xlane.xlu0 %1659  ;;  %v1657_v31 = vpop.xlane.xlu1 %1656 }
 0x4c0   : > { %v1666_v49 = vsub.f32 %v1650_v29, %v1660_v19  ;;  %v1665_v50 = vsub.f32 %v1649_v32, %v1657_v31  ;;  %v4602_v29 = vld [vmem:[%s5682_s5 + $0x8] sm:$0xff]  }
 0x4c2   : > { %v1672_v51 = vmul.f32 1.442695, %v1666_v49  ;;  %v1670_v52 = vmul.f32 1.442695, %v1665_v50 }
 0x4c4   : > { %4648 = vpow2.f32 %v1672_v51 }
 0x4c5   : > { %4650 = vpow2.f32 %v1670_v52 }
 0x4c6   : > { %v4647_v53 = vpop.eup %4646 }
 0x4c7   : > { %v1663_v54 = vpop.xlane.xlu1 %1662  ;;  %v1676_v55 = vsel %vm1459_vm3, %v4647_v53, 0.0 }
 0x4c8   : > { %v1667_v56 = vsub.f32 %v1651_v44, %v1663_v54  ;;  %1677 = vadd.xlane.f32.xlu0 %v1676_v55 }
 0x4ca   : > { %v1674_v57 = vmul.f32 1.442695, %v1667_v56 }
 0x4cc   : > { %4652 = vpow2.f32 %v1674_v57 }
 0x4ce   : > { %v4649_v58 = vpop.eup %4648 }
 0x4cf   : > { %v4651_v59 = vpop.eup %4650  ;;  %v1682_v60 = vsel %vm1459_vm3, %v4649_v58, 0.0 }
 0x4d0   : > { %1683 = vadd.xlane.f32.xlu0 %v1682_v60  ;;  %v1679_v61 = vsel %vm1459_vm3, %v4651_v59, 0.0 }
 0x4d1   : > { %1680 = vadd.xlane.f32.xlu1 %v1679_v61 }
 0x4d6   : > { %v4653_v47 = vpop.eup %4652 }
 0x4d7   : > { %v1685_v62 = vsel %vm1459_vm3, %v4653_v47, 0.0 }
 0x4d8   : > { %1686 = vadd.xlane.f32.xlu1 %v1685_v62 }
 0x555   : > { %v1678_v63 = vpop.xlane.xlu0 %1677 }
 0x556   : > { %4654 = vrcp.f32 %v1678_v63 }
 0x55d   : > { %v1684_v1 = vpop.xlane.xlu0 %1683 }
 0x55e   : > { %4656 = vrcp.f32 %v1684_v1  ;;  %v1681_v2 = vpop.xlane.xlu1 %1680 }
 0x55f   : > { %4658 = vrcp.f32 %v1681_v2 }
 0x560   : > { %v4655_v3 = vpop.eup %4654 }
 0x561   : > { %v1692_v5 = vmul.f32 %v4655_v3, %v4647_v53  ;;  %v1905_v53 = vsub.s32 2, %v4955_v37  ;;  %v4603_v3 = vld [vmem:[%s5683_s6] sm:$0xff]  }
 0x563   : > { %v1696_v8 = vpack.c.bf16 %v1692_v5, %v1692_v5  ;;  %v1906_v54 = vrot.slane %v4963_v39, %v1905_v53 }
 0x565   : > { %4286 = vmatmul.mubr.msk.bf16.vlgmr.msra.gmra.mrb[24].mxu0 %vm1459_vm3, %v1696_v8  ;;  %v1687_v11 = vpop.xlane.xlu1 %1686 }
 0x566   : > { %4296 = vmatpush3.bf16.msra.mxu0 %v1797_v10  ;;  %4660 = vrcp.f32 %v1687_v11  ;;  %4297 = vmatprep.mubr.msk.bf16.mxu0 %vm4756_vm2, %v4755_v30  ;;  %v1978_v10 = vsub.s32 3, %v4955_v37  ;;  %v1983_v11 = vsub.s32 4, %v4955_v37 }
 0x567   : > { %4307 = vmatprep.subr.bf16.mxu0 %v4755_v30 }
 0x568   : > { %v4657_v12 = vpop.eup %4656  ;;  %v1984_v34 = vrot.slane %v4963_v39, %v1983_v11 }
 0x569   : > { %v4659_v13 = vpop.eup %4658  ;;  %v1694_v14 = vmul.f32 %v4657_v12, %v4649_v58  ;;  %v1979_v12 = vrot.slane %v4963_v39, %v1978_v10 }
 0x56a   : > { %v1693_v21 = vmul.f32 %v4659_v13, %v4651_v59 }
 0x56b   : > { %v1698_v22 = vpack.c.bf16 %v1694_v14, %v1694_v14 }
 0x56c   : > { %v1697_v7 = vpack.c.bf16 %v1693_v21, %v1693_v21 }
 0x56d   : > { %4298 = vmatmul.mubr.msk.bf16.vlgmr.msra.gmra.mrb[28].mxu0 %vm1459_vm3, %v1698_v22 }
 0x56e   : > { %4292 = vmatmul.mubr.msk.bf16.vlgmr.msra.gmra.mrb[44].mxu1 %vm1459_vm3, %v1697_v7  ;;  %4311 = vmatprep.mubr.msk.bf16.mxu0 %vm4756_vm2, %v4755_v30 }
 0x56f   : > { %4302 = vmatpush3.bf16.msra.mxu1 %v1843_v23  ;;  %4303 = vmatprep.mubr.msk.bf16.mxu1 %vm4756_vm2, %v4755_v30  ;;  %v4605_v23 = vld [vmem:[%s5684_s7] sm:$0xff]  }
 0x570   : > { %v4661_v24 = vpop.eup %4660  ;;  %4315 = vmatprep.subr.bf16.mxu1 %v4755_v30  ;;  %4308 = vmatpush3.bf16.msra.mxu0 %v4601_v35  ;;  %v3893_v35 = vld [vmem:[%s5686_s9] ss:$0 sm:$0xff] }
 0x571   : > { %v1695_v0 = vmul.f32 %v4661_v24, %v4653_v47  ;;  %4309 = vmatprep.subr.bf16.mxu0 %v4755_v30  ;;  %v4606_v24 = vld [vmem:[%s5684_s7 + $0x8] sm:$0xff]  }
 0x573   : > { %v1699_v25 = vpack.c.bf16 %v1695_v0, %v1695_v0  ;;  %v4607_v0 = vld [vmem:[%s5684_s7 + $0x10] sm:$0xff]  }
 0x574   : > { %4310 = vmatpush3.bf16.msra.mxu0 %v4602_v29 }
 0x575   : > { %4323 = vmatprep.subr.bf16.mxu0 %v4755_v30 }
 0x576   : > { %4304 = vmatmul.mubr.msk.bf16.vlgmr.msra.gmra.mrb[48].mxu1 %vm1459_vm3, %v1699_v25  ;;  %v4608_v25 = vld [vmem:[%s5684_s7 + $0x18] sm:$0xff]  }
 0x577   : > { %4319 = vmatprep.mubr.msk.bf16.mxu1 %vm4756_vm2, %v4755_v30  ;;  %4316 = vmatpush3.bf16.msra.mxu1 %v4603_v3 }
 0x578   : > { %4317 = vmatprep.subr.bf16.mxu1 %v4755_v30 }
 0x638   : > { %v1741_v6 = vpop.f32.mrb[24].mxu0 }
 0x639   : > { %v4287_v26 = vpop.f32.mrb[25].mxu0 }
 0x63a   : > { %v1744_v27 = vpop.f32.mrb[26].mxu0 }
 0x63b   : > { %v4288_v28 = vpop.f32.mrb[27].mxu0 }
 0x640   : > { %v1833_v32 = vpop.f32.mrb[28].mxu0 }
 0x641   : > { %v1787_v17 = vpop.f32.mrb[44].mxu1  ;;  %v4299_v33 = vpop.f32.mrb[29].mxu0  ;;  %1890 = vrot.lane.b32.xlu1 %v1833_v32, %s4759_s21 }
 0x642   : > { %1886 = vrot.lane.b32.xlu0 %v1787_v17, %s4760_s22  ;;  %v4293_v36 = vpop.f32.mrb[45].mxu1  ;;  %v1836_v41 = vpop.f32.mrb[30].mxu0 }
 0x643   : > { %v1790_v42 = vpop.f32.mrb[46].mxu1  ;;  %v4300_v20 = vpop.f32.mrb[31].mxu0 }
 0x644   : > { %v4294_v43 = vpop.f32.mrb[47].mxu1 }
 0x649   : > { %v1879_v44 = vpop.f32.mrb[48].mxu1 }
 0x64a   : > { %1894 = vrot.lane.b32.xlu1 %v1879_v44, %s4761_s23  ;;  %v4305_v45 = vpop.f32.mrb[49].mxu1 }
 0x64b   : > { %v1882_v15 = vpop.f32.mrb[50].mxu1 }
 0x64c   : > { %v4306_v46 = vpop.f32.mrb[51].mxu1  ;;  %v2060_v15 = vsub.s32 5, %v4955_v37  ;;  %v4642_v37 = vld [vmem:[%s5688_s11] sm:$0xff]  }
 0x64e   : > { %v2061_v46 = vrot.slane %v4963_v39, %v2060_v15  ;;  %v4609_v39 = vld [vmem:[%s5680_s3 + $0xc0] sm:$0xff]  }
 0x6b3   : > { %v1891_v19 = vpop.permute.xlu1 %1890 }
 0x6b4   : > { %v1887_v48 = vpop.permute.xlu0 %1886 }
 0x6b5   : > { %v1897_v31 = vsel %vm1459_vm3, %v1741_v6, %v1887_v48 }
 0x6b6   : > { %v1899_v49 = vsel %vm1898_vm6, %v1897_v31, %v1891_v19 }
 0x6bc   : > { %v1895_v50 = vpop.permute.xlu1 %1894 }
 0x6bd   : > { %v1901_v51 = vsel %vm1900_vm7, %v1899_v49, %v1895_v50 }
 0x6be   : > { %v1902_v52 = vpack.c.bf16 %v1901_v51, %v1901_v51 }
 0x6c0   : > { %4312 = vmatmul.mubr.msk.bf16.vlgmr.msra.gmra.mrb[32].mxu0 %vm659_vm1, %v1902_v52 }
 0x6c1   : > { %4331 = vmatprep.mubr.msk.bf16.mxu0 %vm4756_vm2, %v4755_v30  ;;  %4324 = vmatpush3.bf16.msra.mxu0 %v4605_v23  ;;  %v4619_v23 = vld [vmem:[%s5680_s3 + $0xf8] sm:$0xff]  }
 0x6c2   : > { %4325 = vmatprep.subr.bf16.mxu0 %v4755_v30 }
 0x6c5   : > { %4326 = vmatpush3.bf16.msra.mxu0 %v4606_v24  ;;  %v4620_v24 = vld [vmem:[%s5680_s3 + $0x128] sm:$0xff]  }
 0x6c6   : > { %4327 = vmatprep.subr.bf16.mxu0 %v4755_v30 }
 0x6c9   : > { %4328 = vmatpush3.bf16.msra.mxu0 %v4607_v0  ;;  %v4621_v0 = vld [vmem:[%s5680_s3 + $0x110] sm:$0xff]  }
 0x6ca   : > { %4329 = vmatprep.subr.bf16.mxu0 %v4755_v30 }
 0x6cd   : > { %4330 = vmatpush3.bf16.msra.mxu0 %v4608_v25  ;;  %v4622_v25 = vld [vmem:[%s5680_s3 + $0x140] sm:$0xff]  }
 0x6ce   : > { %4351 = vmatprep.subr.bf16.mxu0 %v4755_v30 }
 0x793   : > { %v1956_v55 = vpop.f32.mrb[32].mxu0 }
 0x794   : > { %v1957_v56 = vadd.f32 %v1956_v55, %v1906_v54  ;;  %v4313_v57 = vpop.f32.mrb[33].mxu0 }
 0x795   : > { %v1959_v58 = vpop.f32.mrb[34].mxu0 }
 0x796   : > { %v5235_v59 = vadd.f32 %v1957_v56, %v4926_v18  ;;  %v4314_v60 = vpop.f32.mrb[35].mxu0  ;;  %v4604_v18 = vld [vmem:[%s5683_s6 + $0x8] sm:$0xff]  }
 0x797   : > { %4318 = vmatpush3.bf16.msra.mxu1 %v4604_v18  ;;  %v4611_v60 = vld [vmem:[%s5680_s3 + $0xc8] sm:$0xff]  }
 0x798   : > { %v1963_v61 = vsel %vm659_vm1, %v5235_v59, 0.0  ;;  %4335 = vmatprep.subr.bf16.mxu1 %v4755_v30 }
 0x799   : > { %1964 = vadd.xlane.f32.xlu1 %v1963_v61  ;;  %v4612_v61 = vld [vmem:[%s5680_s3 + $0xe8] sm:$0xff]  }
 0x826   : > { %v1965_v47 = vpop.xlane.xlu1 %1964 }
 0x827   : > { %v1966_v62 = vmul.f32 0.03125, %v1965_v47 }
 0x829   : > { %v1967_v63 = vsub.f32 %v5235_v59, %v1966_v62 }
 0x82b   : > { %v1968_v1 = vmul.f32 %v1967_v63, %v1967_v63 }
 0x82d   : > { %v1969_v2 = vsel %vm659_vm1, %v1968_v1, 0.0  ;;  %v5312_v1 = vld [vmem:[%s5685_s8 + $0x8] sm:$0x3f] }
 0x82e   : > { %1970 = vadd.xlane.f32.xlu0 %v1969_v2  ;;  %v2221_v2 = vrot.slane %v5312_v1, %v4958_v38  ;;  %v2226_v18 = vrot.slane %v5312_v1, %v4966_v40 }
 0x8bb   : > { %v1971_v4 = vpop.xlane.xlu0 %1970 }
 0x8bc   : > { %v1972_v5 = vmul.f32 0.03125, %v1971_v4 }
 0x8be   : > { %v1973_v8 = vadd.f32 1e-06, %v1972_v5 }
 0x8c0   : > { %4662 = vrsqrt.f32 %v1973_v8 }
 0x8ca   : > { %v4663_v13 = vpop.eup %4662 }
 0x8cb   : > { %v1975_v14 = vmul.f32 %v4663_v13, %v1967_v63  ;;  %v4614_v13 = vld [vmem:[%s5680_s3 + $0x100] sm:$0xff]  }
 0x8cd   : > { %v1980_v21 = vmul.f32 %v1979_v12, %v1975_v14  ;;  %v4613_v12 = vld [vmem:[%s5680_s3 + $0xd0] sm:$0xff]  }
 0x8cf   : > { %v1985_v22 = vadd.f32 %v1984_v34, %v1980_v21  ;;  %v4615_v34 = vld [vmem:[%s5680_s3 + $0xd8] sm:$0xff]   ;;  %v4616_v21 = vld [vmem:[%s5680_s3 + $0x108] sm:$0xff]  }
 0x8d1   : > { %v1986_v7 = vpack.c.bf16 %v1985_v22, %v1985_v22  ;;  %v4617_v22 = vld [vmem:[%s5680_s3 + $0xf0] sm:$0xff]  }
 0x8d3   : > { %4320 = vmatmul.mubr.msk.bf16.vlgmr.msra.gmra.mrb[52].mxu1 %vm659_vm1, %v1986_v7  ;;  %v4618_v7 = vld [vmem:[%s5680_s3 + $0x120] sm:$0xff]  }
 0x8d4   : > { %4339 = vmatprep.mubr.msk.bf16.mxu1 %vm4756_vm2, %v4755_v30  ;;  %4336 = vmatpush3.bf16.msra.mxu1 %v4609_v39 }
 0x8d5   : > { %4337 = vmatprep.subr.bf16.mxu1 %v4755_v30 }
 0x8d8   : > { %4338 = vmatpush3.bf16.msra.mxu1 %v4611_v60 }
 0x8d9   : > { %4343 = vmatprep.subr.bf16.mxu1 %v4755_v30 }
 0x9a6   : > { %v2042_v6 = vpop.f32.mrb[52].mxu1 }
 0x9a7   : > { %v2043_v26 = vadd.f32 %v3893_v35, %v2042_v6  ;;  %v4321_v27 = vpop.f32.mrb[53].mxu1  ;;  %v4623_v35 = vld [vmem:[%s5680_s3 + $0x118] sm:$0xff]   ;;  %v4624_v6 = vld [vmem:[%s5680_s3 + $0x148] sm:$0xff]  }
 0x9a8   : > { %v2045_v28 = vpop.f32.mrb[54].mxu1  ;;  %v4626_v27 = vld [vmem:[%s5680_s3 + $0x160] sm:$0xff]  }
 0x9a9   : > { %v2049_v29 = vmul.f32 0.044715, %v2043_v26  ;;  %v4322_v32 = vpop.f32.mrb[55].mxu1  ;;  %v2048_v20 = vmul.f32 0.5, %v2043_v26  ;;  %v4627_v28 = vld [vmem:[%s5680_s3 + $0x138] sm:$0xff]  }
 0x9aa   : > { %v4629_v32 = vld [vmem:[%s5680_s3 + $0x150] sm:$0xff]  }
 0x9ab   : > { %v2050_v17 = vmul.f32 %v2049_v29, %v2043_v26  ;;  %v4628_v29 = vld [vmem:[%s5680_s3 + $0x168] sm:$0xff]  }
 0x9ad   : > { %v2051_v33 = vmul.f32 %v2050_v17, %v2043_v26  ;;  %v4630_v17 = vld [vmem:[%s5680_s3 + $0x158] sm:$0xff]  }
 0x9af   : > { %v2052_v36 = vadd.f32 %v2051_v33, %v2043_v26  ;;  %v4625_v26 = vld [vmem:[%s5680_s3 + $0x130] sm:$0xff]  }
 0x9b0   : > { %v4631_v33 = vld [vmem:[%s5680_s3 + $0x170] sm:$0xff]  }
 0x9b1   : > { %v2053_v41 = vmul.f32 0.7978846, %v2052_v36  ;;  %v4632_v36 = vld [vmem:[%s5680_s3 + $0x178] sm:$0xff]  }
 0x9b3   : > { %4664 = vtanh.f32 %v2053_v41  ;;  %v3950_v41 = vld [vmem:[%s5681_s4 + $0x10] sm:$0xff] }
 0x9bd   : > { %v4665_v42 = vpop.eup %4664 }
 0x9be   : > { %v2055_v43 = vadd.f32 1.0, %v4665_v42  ;;  %v2485_v42 = vcombine.high %v3950_v41, %v3950_v41 }
 0x9c0   : > { %v2056_v44 = vmul.f32 %v2055_v43, %v2048_v20  ;;  %v2492_v20 = vrot.slane %v2485_v42, %v5108_v16 }
 0x9c2   : > { %v2057_v45 = vpack.c.bf16 %v2056_v44, %v2056_v44 }
 0x9c4   : > { %4332 = vmatmul.mubr.msk.bf16.vlgmr.msra.gmra.mrb[36].mxu0 %vm543_vm0, %v2057_v45 }
 0x9c5   : > { %4355 = vmatprep.mubr.msk.bf16.mxu0 %vm4756_vm2, %v4755_v30 }
 0xa97   : > { %v2123_v48 = vpop.f32.mrb[36].mxu0 }
 0xa98   : > { %v2124_v19 = vadd.f32 %v2123_v48, %v2061_v46  ;;  %v4333_v31 = vpop.f32.mrb[37].mxu0  ;;  %v2500_v48 = vrot.slane %v2492_v20, %v5108_v16 }
 0xa99   : > { %v2126_v49 = vpop.f32.mrb[38].mxu0 }
 0xa9a   : > { %v5287_v50 = vadd.f32 %v2124_v19, %v5235_v59  ;;  %v4334_v51 = vpop.f32.mrb[39].mxu0  ;;  %v4610_v59 = vld [vmem:[%s5680_s3 + $0xe0] sm:$0xff]   ;;  %v2508_v60 = vcombine.high %v2500_v48, %v2500_v48 }
 0xa9b   : > { %4352 = vmatpush3.bf16.msra.mxu0 %v4610_v59 }
 0xa9c   : > { %v2205_v52 = vsel %vm659_vm1, %v5287_v50, 0.0  ;;  %4353 = vmatprep.subr.bf16.mxu0 %v4755_v30 }
 0xa9d   : > { %2206 = vadd.xlane.f32.xlu0 %v2205_v52  ;;  %v2236_v52 = vrot.slane %v3950_v41, %v5108_v16 }
 0xa9f   : > { %4354 = vmatpush3.bf16.msra.mxu0 %v4612_v61 }
 0xaa0   : > { %4367 = vmatprep.subr.bf16.mxu0 %v4755_v30 }
 0xb2a   : > { %v2207_v54 = vpop.xlane.xlu0 %2206 }
 0xb2b   : > { %v2208_v55 = vmul.f32 0.03125, %v2207_v54  ;;  %v2513_v54 = vrot.slane %v2500_v48, %v4958_v38 }
 0xb2d   : > { %v2209_v56 = vsub.f32 %v5287_v50, %v2208_v55 }
 0xb2f   : > { %v2210_v57 = vmul.f32 %v2209_v56, %v2209_v56 }
 0xb31   : > { %v2211_v58 = vsel %vm659_vm1, %v2210_v57, 0.0  ;;  %v2244_v57 = vrot.slane %v2236_v52, %v5108_v16 }
 0xb32   : > { %2212 = vadd.xlane.f32.xlu0 %v2211_v58 }
 0xbbf   : > { %v2213_v47 = vpop.xlane.xlu0 %2212 }
 0xbc0   : > { %v2214_v62 = vmul.f32 0.03125, %v2213_v47 }
 0xbc2   : > { %v2215_v63 = vadd.f32 1e-06, %v2214_v62  ;;  %v2257_v62 = vrot.slane %v2244_v57, %v4958_v38 }
 0xbc4   : > { %4666 = vrsqrt.f32 %v2215_v63 }
 0xbce   : > { %v4667_v3 = vpop.eup %4666 }
 0xbcf   : > { %v2217_v4 = vmul.f32 %v4667_v3, %v2209_v56 }
 0xbd1   : > { %v2222_v5 = vmul.f32 %v2221_v2, %v2217_v4  ;;  %v2521_v4 = vrot.slane %v2508_v60, %v4958_v38 }
 0xbd3   : > { %v2227_v8 = vadd.f32 %v2226_v18, %v2222_v5  ;;  %v2493_v5 = vcombine.high %v2492_v20, %v2492_v20 }
 0xbd5   : > { %v5324_v14 = vpack.c.bf16 %v2227_v8, %v2227_v8  ;;  %v5464_v8 = vld.sshfl [vmem:[%s5681_s4 + $0x18] sm:$0x33 pattern:$0x75316420] }
 0xbd7   : > { %4340 = vmatmul.mubr.msk.bf16.vlgmr.msra.gmra.mrb[56].mxu1 %vm659_vm1, %v5324_v14  ;;  %4356 = vmatmul.mubr.msk.bf16.vlgmr.msra.gmra.mrb[40].mxu0 %vm659_vm1, %v5324_v14 }
 0xbd8   : > { %4344 = vmatpush3.bf16.msra.mxu1 %v4613_v12  ;;  %4368 = vmatpush3.bf16.msra.mxu0 %v4614_v13  ;;  %v2252_v13 = vcombine.high %v2244_v57, %v2244_v57 }
 0xbd9   : > { %4345 = vmatprep.subr.bf16.mxu1 %v4755_v30  ;;  %4369 = vmatprep.subr.bf16.mxu0 %v4755_v30 }
 0xbda   : > { %4347 = vmatprep.mubr.msk.bf16.mxu1 %vm4756_vm2, %v4755_v30  ;;  %4371 = vmatprep.mubr.msk.bf16.mxu0 %vm4756_vm2, %v4755_v30 }
 0xbdc   : > { %4346 = vmatpush3.bf16.msra.mxu1 %v4615_v34  ;;  %4370 = vmatpush3.bf16.msra.mxu0 %v4616_v21 }
 0xbdd   : > { %4359 = vmatprep.subr.bf16.mxu1 %v4755_v30  ;;  %4383 = vmatprep.subr.bf16.mxu0 %v4755_v30 }
 0xbdf   : > { %4348 = vmatmul.mubr.msk.bf16.vlgmr.msra.gmra.mrb[60].mxu1 %vm659_vm1, %v5324_v14  ;;  %4372 = vmatmul.mubr.msk.bf16.vlgmr.msra.gmra.mrb[44].mxu0 %vm659_vm1, %v5324_v14 }
 0xbe0   : > { %4360 = vmatpush3.bf16.msra.mxu1 %v4617_v22  ;;  %4384 = vmatpush3.bf16.msra.mxu0 %v4618_v7 }
 0xbe1   : > { %4361 = vmatprep.subr.bf16.mxu1 %v4755_v30  ;;  %4385 = vmatprep.subr.bf16.mxu0 %v4755_v30 }
 0xbe2   : > { %4363 = vmatprep.mubr.msk.bf16.mxu1 %vm4756_vm2, %v4755_v30  ;;  %4387 = vmatprep.mubr.msk.bf16.mxu0 %vm4756_vm2, %v4755_v30 }
 0xbe4   : > { %4362 = vmatpush3.bf16.msra.mxu1 %v4619_v23  ;;  %4386 = vmatpush3.bf16.msra.mxu0 %v4620_v24  ;;  %v2507_v23 = vrot.slane %v2493_v5, %v5108_v16  ;;  %v2753_v24 = vrot.slane %v5464_v8, %v5108_v16 }
 0xbe5   : > { %4375 = vmatprep.subr.bf16.mxu1 %v4755_v30  ;;  %4399 = vmatprep.subr.bf16.mxu0 %v4755_v30 }
 0xbe7   : > { %4364 = vmatmul.mubr.msk.bf16.vlgmr.msra.gmra.mrb[64].mxu1 %vm659_vm1, %v5324_v14  ;;  %4388 = vmatmul.mubr.msk.bf16.vlgmr.msra.gmra.mrb[48].mxu0 %vm659_vm1, %v5324_v14 }
 0xbe8   : > { %4376 = vmatpush3.bf16.msra.mxu1 %v4621_v0  ;;  %4400 = vmatpush3.bf16.msra.mxu0 %v4622_v25 }
 0xbe9   : > { %4377 = vmatprep.subr.bf16.mxu1 %v4755_v30  ;;  %4401 = vmatprep.subr.bf16.mxu0 %v4755_v30 }
 0xbea   : > { %4379 = vmatprep.mubr.msk.bf16.mxu1 %vm4756_vm2, %v4755_v30  ;;  %4403 = vmatprep.mubr.msk.bf16.mxu0 %vm4756_vm2, %v4755_v30 }
 0xbec   : > { %4378 = vmatpush3.bf16.msra.mxu1 %v4623_v35  ;;  %4402 = vmatpush3.bf16.msra.mxu0 %v4624_v6  ;;  %v2265_v6 = vrot.slane %v2252_v13, %v4958_v38 }
 0xbed   : > { %4391 = vmatprep.subr.bf16.mxu1 %v4755_v30  ;;  %4415 = vmatprep.subr.bf16.mxu0 %v4755_v30 }
 0xbef   : > { %4380 = vmatmul.mubr.msk.bf16.vlgmr.msra.gmra.mrb[68].mxu1 %vm659_vm1, %v5324_v14  ;;  %4404 = vmatmul.mubr.msk.bf16.vlgmr.msra.gmra.mrb[52].mxu0 %vm659_vm1, %v5324_v14 }
 0xbf0   : > { %4392 = vmatpush3.bf16.msra.mxu1 %v4625_v26  ;;  %4416 = vmatpush3.bf16.msra.mxu0 %v4626_v27  ;;  %v2237_v26 = vcombine.high %v2236_v52, %v2236_v52 }
 0xbf1   : > { %4393 = vmatprep.subr.bf16.mxu1 %v4755_v30  ;;  %4417 = vmatprep.subr.bf16.mxu0 %v4755_v30 }
 0xbf2   : > { %4395 = vmatprep.mubr.msk.bf16.mxu1 %vm4756_vm2, %v4755_v30  ;;  %4419 = vmatprep.mubr.msk.bf16.mxu0 %vm4756_vm2, %v4755_v30  ;;  %v2251_v41 = vrot.slane %v2237_v26, %v5108_v16 }
 0xbf4   : > { %4394 = vmatpush3.bf16.msra.mxu1 %v4627_v28  ;;  %4418 = vmatpush3.bf16.msra.mxu0 %v4628_v29 }
 0xbf5   : > { %4407 = vmatprep.subr.bf16.mxu1 %v4755_v30  ;;  %4431 = vmatprep.subr.bf16.mxu0 %v4755_v30 }
 0xbf7   : > { %4396 = vmatmul.mubr.msk.bf16.vlgmr.msra.gmra.mrb[72].mxu1 %vm659_vm1, %v5324_v14  ;;  %4420 = vmatmul.mubr.msk.bf16.vlgmr.msra.gmra.mrb[56].mxu0 %vm659_vm1, %v5324_v14 }
 0xbf8   : > { %4408 = vmatpush3.bf16.msra.mxu1 %v4629_v32  ;;  %4411 = vmatprep.mubr.msk.bf16.mxu1 %vm4756_vm2, %v4755_v30 }
 0xbf9   : > { %4409 = vmatprep.subr.bf16.mxu1 %v4755_v30  ;;  %4433 = vmatprep.mubr.msk.bf16.mxu0 %vm4756_vm2, %v4755_v30 }
 0xbfc   : > { %4410 = vmatpush3.bf16.msra.mxu1 %v4630_v17  ;;  %v2517_v17 = vrot.slane %v2507_v23, %v4958_v38 }
 0xbfd   : > { %4423 = vmatprep.subr.bf16.mxu1 %v4755_v30 }
 0xbff   : > { %4412 = vmatmul.mubr.msk.bf16.vlgmr.msra.gmra.mrb[76].mxu1 %vm659_vm1, %v5324_v14 }
 0xc00   : > { %4424 = vmatpush3.bf16.msra.mxu1 %v4631_v33  ;;  %4427 = vmatprep.mubr.msk.bf16.mxu1 %vm4756_vm2, %v4755_v30  ;;  %v2766_v33 = vrot.slane %v2753_v24, %v4958_v38 }
 0xc01   : > { %4425 = vmatprep.subr.bf16.mxu1 %v4755_v30 }
 0xc04   : > { %4426 = vmatpush3.bf16.msra.mxu1 %v4632_v36 }
 0xc05   : > { %4437 = vmatprep.subr.bf16.mxu1 %v4755_v30 }
 0xc07   : > { %4428 = vmatmul.mubr.msk.bf16.vlgmr.msra.gmra.mrb[80].mxu1 %vm659_vm1, %v5324_v14 }
 0xc08   : > { %4439 = vmatprep.mubr.msk.bf16.mxu1 %vm4756_vm2, %v4755_v30 }
 0xcaa   : > { %v2323_v43 = vpop.f32.mrb[56].mxu1  ;;  %v2427_v44 = vpop.f32.mrb[40].mxu0 }
 0xcab   : > { %v4341_v45 = vpop.f32.mrb[57].mxu1  ;;  %v4357_v46 = vpop.f32.mrb[41].mxu0  ;;  %v2324_v12 = vadd.f32 %v2323_v43, %v2257_v62  ;;  %v2428_v36 = vadd.f32 %v2427_v44, %v2265_v6  ;;  %v2509_v43 = vcombine.high %v2507_v23, %v2507_v23 }
 0xcac   : > { %v2326_v19 = vpop.f32.mrb[58].mxu1  ;;  %v2430_v31 = vpop.f32.mrb[42].mxu0 }
 0xcad   : > { %v4342_v49 = vpop.f32.mrb[59].mxu1  ;;  %v4358_v51 = vpop.f32.mrb[43].mxu0  ;;  %v2991_v35 = vpack.c.bf16 %v2324_v12, %v2324_v12  ;;  %v2761_v31 = vcombine.high %v2753_v24, %v2753_v24  ;;  %v2993_v52 = vpack.c.bf16 %v2428_v36, %v2428_v36 }
 0xcb2   : > { %v5455_v55 = vpop.f32.mrb[60].mxu1  ;;  %v2576_v56 = vpop.f32.mrb[44].mxu0 }
 0xcb3   : > { %v2577_v58 = vadd.f32 %v2576_v56, %v2513_v54  ;;  %v4349_v39 = vpop.f32.mrb[61].mxu1  ;;  %v4373_v59 = vpop.f32.mrb[45].mxu0  ;;  %v2261_v54 = vrot.slane %v2251_v41, %v4958_v38 }
 0xcb4   : > { %v2378_v61 = vpop.f32.mrb[62].mxu1  ;;  %v2579_v47 = vpop.f32.mrb[46].mxu0  ;;  %v2525_v39 = vrot.slane %v2509_v43, %v4958_v38 }
 0xcb5   : > { %v2995_v63 = vpack.c.bf16 %v2577_v58, %v2577_v58  ;;  %v4350_v2 = vpop.f32.mrb[63].mxu1  ;;  %v4374_v3 = vpop.f32.mrb[47].mxu0  ;;  %v2774_v61 = vrot.slane %v2761_v31, %v4958_v38  ;;  %v2746_v47 = vcombine.high %v5464_v8, %v5464_v8  ;;  %v2376_v62 = vadd.f32 %v5455_v55, %v2261_v54 }
 0xcb7   : > { %v3007_v18 = vsel %vm1459_vm3, %v2995_v63, 0  ;;  %v2253_v63 = vcombine.high %v2251_v41, %v2251_v41  ;;  %v2760_v8 = vrot.slane %v2746_v47, %v5108_v16  ;;  %v2992_v55 = vpack.c.bf16 %v2376_v62, %v2376_v62 }
 0xcb8   : > { %4432 = vmatpush3.bf16.xpose.msra.mxu0 %v3007_v18 }
 0xcb9   : > { %4443 = vmatprep.subr.bf16.mxu0 %v4755_v30  ;;  %v2762_v26 = vcombine.high %v2760_v8, %v2760_v8 }
 0xcba   : > { %v5467_v14 = vpop.f32.mrb[64].mxu1  ;;  %v2680_v34 = vpop.f32.mrb[48].mxu0 }
 0xcbb   : > { %v2681_v21 = vadd.f32 %v2680_v34, %v2521_v4  ;;  %v4365_v22 = vpop.f32.mrb[65].mxu1  ;;  %v4389_v7 = vpop.f32.mrb[49].mxu0 }
 0xcbc   : > { %v2482_v0 = vpop.f32.mrb[66].mxu1  ;;  %v2683_v25 = vpop.f32.mrb[50].mxu0 }
 0xcbd   : > { %v2997_v27 = vpack.c.bf16 %v2681_v21, %v2681_v21  ;;  %v4366_v28 = vpop.f32.mrb[67].mxu1  ;;  %v4390_v29 = vpop.f32.mrb[51].mxu0  ;;  %v2269_v21 = vrot.slane %v2253_v63, %v4958_v38  ;;  %v2770_v0 = vrot.slane %v2760_v8, %v4958_v38 }
 0xcbf   : > { %v3099_v32 = vsel %vm1459_vm3, %v2997_v27, 0  ;;  %4434 = vmatmul.mubr.msk.bf16.vlgmr.msra.gmra.mrb[60].mxu0 %vm1459_vm3, %v2991_v35  ;;  %v2480_v16 = vadd.f32 %v5467_v14, %v2269_v21 }
 0xcc0   : > { %4444 = vmatpush3.bf16.xpose.msra.mxu0 %v3099_v32  ;;  %4445 = vmatprep.mubr.msk.bf16.mxu0 %vm4756_vm2, %v4755_v30 }
 0xcc1   : > { %4455 = vmatprep.subr.bf16.mxu0 %v4755_v30  ;;  %v2994_v28 = vpack.c.bf16 %v2480_v16, %v2480_v16 }
 0xcc2   : > { %v2628_v42 = vpop.f32.mrb[68].mxu1  ;;  %v2829_v20 = vpop.f32.mrb[52].mxu0 }
 0xcc3   : > { %v2629_v45 = vadd.f32 %v2628_v42, %v2517_v17  ;;  %v2830_v46 = vadd.f32 %v2829_v20, %v2766_v33  ;;  %v4381_v48 = vpop.f32.mrb[69].mxu1  ;;  %v4405_v19 = vpop.f32.mrb[53].mxu0  ;;  %v2778_v33 = vrot.slane %v2762_v26, %v4958_v38 }
 0xcc4   : > { %v2631_v49 = vpop.f32.mrb[70].mxu1  ;;  %v2832_v51 = vpop.f32.mrb[54].mxu0 }
 0xcc5   : > { %v2996_v56 = vpack.c.bf16 %v2629_v45, %v2629_v45  ;;  %v2999_v57 = vpack.c.bf16 %v2830_v46, %v2830_v46  ;;  %v4382_v44 = vpop.f32.mrb[71].mxu1  ;;  %v4406_v58 = vpop.f32.mrb[55].mxu0 }
 0xcc7   : > { %v3053_v59 = vsel %vm1459_vm3, %v2996_v56, 0  ;;  %v3247_v60 = vsel %vm1703_vm4, %v2999_v57, 0  ;;  %4446 = vmatmul.mubr.msk.bf16.vlgmr.msra.gmra.mrb[64].mxu0 %vm1459_vm3, %v2993_v52 }
 0xcc8   : > { %4438 = vmatpush3.bf16.xpose.msra.mxu1 %v3053_v59  ;;  %4456 = vmatpush3.bf16.msra.mxu0 %v3247_v60 }
 0xcc9   : > { %4449 = vmatprep.subr.bf16.mxu1 %v4755_v30  ;;  %4457 = vmatprep.mubr.msk.bf16.mxu0 %vm4756_vm2, %v4755_v30 }
 0xcca   : > { %v2732_v2 = vpop.f32.mrb[72].mxu1  ;;  %v2933_v3 = vpop.f32.mrb[56].mxu0  ;;  %4467 = vmatprep.subr.bf16.mxu0 %v4755_v30 }
 0xccb   : > { %v2733_v18 = vadd.f32 %v2732_v2, %v2525_v39  ;;  %v5494_v4 = vadd.f32 %v2933_v3, %v2774_v61  ;;  %v4397_v5 = vpop.f32.mrb[73].mxu1  ;;  %v4421_v12 = vpop.f32.mrb[57].mxu0 }
 0xccc   : > { %v2735_v13 = vpop.f32.mrb[74].mxu1  ;;  %v2936_v34 = vpop.f32.mrb[58].mxu0 }
 0xccd   : > { %v2998_v22 = vpack.c.bf16 %v2733_v18, %v2733_v18  ;;  %v4398_v7 = vpop.f32.mrb[75].mxu1  ;;  %v4422_v23 = vpop.f32.mrb[59].mxu0 }
 0xccf   : > { %v3145_v24 = vsel %vm1459_vm3, %v2998_v22, 0  ;;  %4440 = vmatmul.mubr.msk.bf16.vlgmr.msra.gmra.mrb[84].mxu1 %vm1459_vm3, %v2992_v55 }
 0xcd0   : > { %4450 = vmatpush3.bf16.xpose.msra.mxu1 %v3145_v24  ;;  %4451 = vmatprep.mubr.msk.bf16.mxu1 %vm4756_vm2, %v4755_v30 }
 0xcd1   : > { %4461 = vmatprep.subr.bf16.mxu1 %v4755_v30 }
 0xcd2   : > { %v2881_v25 = vpop.f32.mrb[76].mxu1 }
 0xcd3   : > { %v2882_v35 = vadd.f32 %v2881_v25, %v2770_v0  ;;  %v4413_v6 = vpop.f32.mrb[77].mxu1 }
 0xcd4   : > { %v2884_v27 = vpop.f32.mrb[78].mxu1 }
 0xcd5   : > { %v3000_v29 = vpack.c.bf16 %v2882_v35, %v2882_v35  ;;  %v4414_v32 = vpop.f32.mrb[79].mxu1 }
 0xcd7   : > { %v3293_v17 = vsel %vm1703_vm4, %v3000_v29, 0  ;;  %4452 = vmatmul.mubr.msk.bf16.vlgmr.msra.gmra.mrb[88].mxu1 %vm1459_vm3, %v2994_v28 }
 0xcd8   : > { %4462 = vmatpush3.bf16.msra.mxu1 %v3293_v17  ;;  %4463 = vmatprep.mubr.msk.bf16.mxu1 %vm4756_vm2, %v4755_v30 }
 0xcd9   : > { %4473 = vmatprep.subr.bf16.mxu1 %v4755_v30 }
 0xcda   : > { %v2985_v14 = vpop.f32.mrb[80].mxu1 }
 0xcdb   : > { %v5511_v36 = vadd.f32 %v2985_v14, %v2778_v33  ;;  %v4429_v41 = vpop.f32.mrb[81].mxu1 }
 0xcdc   : > { %v2988_v42 = vpop.f32.mrb[82].mxu1 }
 0xcdd   : > { %v4430_v20 = vpop.f32.mrb[83].mxu1 }
 0xcde   : > { %v3001_v20 = vpack.c.bf16 %v5494_v4, %v5494_v4 }
 0xd92   : > { %v3043_v43 = vpop.f32.mrb[60].mxu0 }
 0xd93   : > { %v3187_v45 = vmul.f32 0.35355338, %v3043_v43  ;;  %v4435_v46 = vpop.f32.mrb[61].mxu0 }
 0xd94   : > { %v3046_v48 = vpop.f32.mrb[62].mxu0  ;;  %v3339_v46 = vsel %vm1703_vm4, %v3001_v20, 0 }
 0xd95   : > { %v4436_v19 = vpop.f32.mrb[63].mxu0  ;;  %v3191_v31 = vadd.f32 %v3187_v45, %v5179_v9 }
 0xd97   : > { %v3195_v49 = vsel %vm1459_vm3, %v3191_v31, -inf }
 0xd98   : > { %3196 = vmax.xlane.f32.xlu1 %v3195_v49 }
 0xd9a   : > { %v3135_v51 = vpop.f32.mrb[64].mxu0 }
 0xd9b   : > { %v3189_v52 = vmul.f32 0.35355338, %v3135_v51  ;;  %v4447_v54 = vpop.f32.mrb[65].mxu0 }
 0xd9c   : > { %v3138_v56 = vpop.f32.mrb[66].mxu0 }
 0xd9d   : > { %v4448_v57 = vpop.f32.mrb[67].mxu0  ;;  %v3193_v44 = vadd.f32 %v3189_v52, %v5179_v9  ;;  %v3002_v52 = vpack.c.bf16 %v5511_v36, %v5511_v36 }
 0xd9f   : > { %v3201_v58 = vsel %vm1459_vm3, %v3193_v44, -inf  ;;  %v3385_v57 = vsel %vm1703_vm4, %v3002_v52, 0 }
 0xda0   : > { %3202 = vmax.xlane.f32.xlu1 %v3201_v58 }
 0xda2   : > { %v3089_v39 = vpop.f32.mrb[84].mxu1 }
 0xda3   : > { %v3188_v59 = vmul.f32 0.35355338, %v3089_v39  ;;  %v4441_v60 = vpop.f32.mrb[85].mxu1 }
 0xda4   : > { %v3092_v61 = vpop.f32.mrb[86].mxu1 }
 0xda5   : > { %v4442_v47 = vpop.f32.mrb[87].mxu1  ;;  %v3192_v62 = vadd.f32 %v3188_v59, %v5179_v9 }
 0xda6   : > { %v4634_v47 = vld [vmem:[%s5682_s5 + $0x10] sm:$0xff]  }
 0xda7   : > { %v3198_v63 = vsel %vm1459_vm3, %v3192_v62, -inf }
 0xda8   : > { %3199 = vmax.xlane.f32.xlu0 %v3198_v63 }
 0xdaa   : > { %v3181_v2 = vpop.f32.mrb[88].mxu1 }
 0xdab   : > { %v3190_v3 = vmul.f32 0.35355338, %v3181_v2  ;;  %v4453_v18 = vpop.f32.mrb[89].mxu1 }
 0xdac   : > { %v3184_v5 = vpop.f32.mrb[90].mxu1  ;;  %v4635_v18 = vld [vmem:[%s5682_s5 + $0x18] sm:$0xff]  }
 0xdad   : > { %v4454_v12 = vpop.f32.mrb[91].mxu1  ;;  %v3194_v8 = vadd.f32 %v3190_v3, %v5179_v9 }
 0xdaf   : > { %v3204_v13 = vsel %vm1459_vm3, %v3194_v8, -inf }
 0xdb0   : > { %3205 = vmax.xlane.f32.xlu0 %v3204_v13 }
 0xe25   : > { %v3197_v34 = vpop.xlane.xlu1 %3196 }
 0xe26   : > { %v3207_v55 = vsub.f32 %v3191_v31, %v3197_v34 }
 0xe28   : > { %v3211_v21 = vmul.f32 1.442695, %v3207_v55 }
 0xe2a   : > { %4668 = vpow2.f32 %v3211_v21 }
 0xe2d   : > { %v3203_v22 = vpop.xlane.xlu1 %3202 }
 0xe2e   : > { %v3209_v7 = vsub.f32 %v3193_v44, %v3203_v22 }
 0xe30   : > { %v3215_v23 = vmul.f32 1.442695, %v3209_v7 }
 0xe32   : > { %4670 = vpow2.f32 %v3215_v23 }
 0xe34   : > { %v4669_v24 = vpop.eup %4668 }
 0xe35   : > { %v3200_v0 = vpop.xlane.xlu0 %3199  ;;  %v3219_v16 = vsel %vm1459_vm3, %v4669_v24, 0.0 }
 0xe36   : > { %v3208_v25 = vsub.f32 %v3192_v62, %v3200_v0  ;;  %3220 = vadd.xlane.f32.xlu1 %v3219_v16 }
 0xe38   : > { %v3213_v35 = vmul.f32 1.442695, %v3208_v25 }
 0xe3a   : > { %4672 = vpow2.f32 %v3213_v35 }
 0xe3c   : > { %v4671_v9 = vpop.eup %4670 }
 0xe3d   : > { %v3206_v6 = vpop.xlane.xlu0 %3205  ;;  %v3225_v26 = vsel %vm1459_vm3, %v4671_v9, 0.0 }
 0xe3e   : > { %v3210_v27 = vsub.f32 %v3194_v8, %v3206_v6  ;;  %3226 = vadd.xlane.f32.xlu1 %v3225_v26 }
 0xe40   : > { %v3217_v28 = vmul.f32 1.442695, %v3210_v27 }
 0xe42   : > { %4674 = vpow2.f32 %v3217_v28 }
 0xe44   : > { %v4673_v29 = vpop.eup %4672 }
 0xe45   : > { %v3222_v32 = vsel %vm1459_vm3, %v4673_v29, 0.0 }
 0xe46   : > { %3223 = vadd.xlane.f32.xlu0 %v3222_v32 }
 0xe4c   : > { %v4675_v17 = vpop.eup %4674 }
 0xe4d   : > { %v3228_v33 = vsel %vm1459_vm3, %v4675_v17, 0.0 }
 0xe4e   : > { %3229 = vadd.xlane.f32.xlu0 %v3228_v33 }
 0xec3   : > { %v3221_v14 = vpop.xlane.xlu1 %3220 }
 0xec4   : > { %4676 = vrcp.f32 %v3221_v14 }
 0xecb   : > { %v3227_v41 = vpop.xlane.xlu1 %3226 }
 0xecc   : > { %4678 = vrcp.f32 %v3227_v41 }
 0xece   : > { %v4677_v42 = vpop.eup %4676 }
 0xecf   : > { %v3235_v43 = vmul.f32 %v4677_v42, %v4669_v24 }
 0xed1   : > { %v3239_v45 = vpack.c.bf16 %v3235_v43, %v3235_v43 }
 0xed3   : > { %4458 = vmatmul.mubr.msk.bf16.vlgmr.msra.gmra.mrb[68].mxu0 %vm1459_vm3, %v3239_v45  ;;  %v3224_v48 = vpop.xlane.xlu0 %3223 }
 0xed4   : > { %4468 = vmatpush3.bf16.msra.mxu0 %v3339_v46  ;;  %4680 = vrcp.f32 %v3224_v48  ;;  %4469 = vmatprep.mubr.msk.bf16.mxu0 %vm4756_vm2, %v4755_v30  ;;  %v3519_v48 = vrot.slane %v5312_v1, %v1978_v10  ;;  %v4639_v10 = vld [vmem:[%s5684_s7 + $0x28] sm:$0xff]  }
 0xed5   : > { %4479 = vmatprep.subr.bf16.mxu0 %v4755_v30 }
 0xed6   : > { %v4679_v19 = vpop.eup %4678 }
 0xed7   : > { %v3237_v31 = vmul.f32 %v4679_v19, %v4671_v9  ;;  %v3446_v9 = vrot.slane %v5312_v1, %v1905_v53  ;;  %v4636_v53 = vld [vmem:[%s5683_s6 + $0x10] sm:$0xff]  }
 0xed9   : > { %v3241_v49 = vpack.c.bf16 %v3237_v31, %v3237_v31 }
 0xedb   : > { %4470 = vmatmul.mubr.msk.bf16.vlgmr.msra.gmra.mrb[72].mxu0 %vm1459_vm3, %v3241_v49  ;;  %v3230_v4 = vpop.xlane.xlu0 %3229  ;;  %v3524_v49 = vrot.slane %v5312_v1, %v1983_v11  ;;  %v4640_v11 = vld [vmem:[%s5684_s7 + $0x30] sm:$0xff]  }
 0xedc   : > { %4682 = vrcp.f32 %v3230_v4  ;;  %4483 = vmatprep.mubr.msk.bf16.mxu0 %vm4756_vm2, %v4755_v30  ;;  %4480 = vmatpush3.bf16.msra.mxu0 %v4634_v47 }
 0xedd   : > { %4481 = vmatprep.subr.bf16.mxu0 %v4755_v30 }
 0xede   : > { %v4681_v51 = vpop.eup %4680 }
 0xedf   : > { %v3236_v54 = vmul.f32 %v4681_v51, %v4673_v29 }
 0xee0   : > { %4482 = vmatpush3.bf16.msra.mxu0 %v4635_v18 }
 0xee1   : > { %v3240_v56 = vpack.c.bf16 %v3236_v54, %v3236_v54  ;;  %4495 = vmatprep.subr.bf16.mxu0 %v4755_v30  ;;  %v4638_v54 = vld [vmem:[%s5684_s7 + $0x20] sm:$0xff]  }
 0xee3   : > { %4464 = vmatmul.mubr.msk.bf16.vlgmr.msra.gmra.mrb[92].mxu1 %vm1459_vm3, %v3240_v56  ;;  %v4641_v56 = vld [vmem:[%s5684_s7 + $0x38] sm:$0xff]  }
 0xee4   : > { %4474 = vmatpush3.bf16.msra.mxu1 %v3385_v57  ;;  %4475 = vmatprep.mubr.msk.bf16.mxu1 %vm4756_vm2, %v4755_v30  ;;  %v4018_v57 = vld [vmem:[%s5686_s9 + $0x1] ss:$0 sm:$0xff] }
 0xee5   : > { %4487 = vmatprep.subr.bf16.mxu1 %v4755_v30 }
 0xee6   : > { %v4683_v44 = vpop.eup %4682 }
 0xee7   : > { %v3238_v58 = vmul.f32 %v4683_v44, %v4675_v17 }
 0xee9   : > { %v3242_v39 = vpack.c.bf16 %v3238_v58, %v3238_v58 }
 0xeeb   : > { %4476 = vmatmul.mubr.msk.bf16.vlgmr.msra.gmra.mrb[96].mxu1 %vm1459_vm3, %v3242_v39 }
 0xeec   : > { %4491 = vmatprep.mubr.msk.bf16.mxu1 %vm4756_vm2, %v4755_v30  ;;  %4488 = vmatpush3.bf16.msra.mxu1 %v4636_v53 }
 0xeed   : > { %4489 = vmatprep.subr.bf16.mxu1 %v4755_v30 }
 0xfa6   : > { %v3283_v36 = vpop.f32.mrb[68].mxu0 }
 0xfa7   : > { %v4459_v59 = vpop.f32.mrb[69].mxu0 }
 0xfa8   : > { %v3286_v60 = vpop.f32.mrb[70].mxu0 }
 0xfa9   : > { %v4460_v61 = vpop.f32.mrb[71].mxu0 }
 0xfae   : > { %v3375_v62 = vpop.f32.mrb[72].mxu0 }
 0xfaf   : > { %v4471_v63 = vpop.f32.mrb[73].mxu0  ;;  %3432 = vrot.lane.b32.xlu0 %v3375_v62, %s4759_s21  ;;  %s4696_s21 = scalar_lea.vmem %s4695_s20, 32 }
 0xfb0   : > { %v3378_v2 = vpop.f32.mrb[74].mxu0 }
 0xfb1   : > { %v4472_v3 = vpop.f32.mrb[75].mxu0 }
 0xfb6   : > { %v3329_v5 = vpop.f32.mrb[92].mxu1 }
 0xfb7   : > { %3428 = vrot.lane.b32.xlu1 %v3329_v5, %s4760_s22  ;;  %v4465_v12 = vpop.f32.mrb[93].mxu1  ;;  %s4030_s22 = sshll.u32 %s4854_s29, 4 }
 0xfb8   : > { %v3332_v8 = vpop.f32.mrb[94].mxu1  ;;  %s5635_s14 = scalar_lea.hbm %s5690_s13, %s4030_s22 }
 0xfb9   : > { %v4466_v13 = vpop.f32.mrb[95].mxu1  ;;  %v3601_v8 = vrot.slane %v5312_v1, %v2060_v15  ;;  %v4643_v15 = vld [vmem:[%s5688_s11 + $0x8] sm:$0xff]  }
 0xfbe   : > { %v3421_v34 = vpop.f32.mrb[96].mxu1 }
 0xfbf   : > { %3436 = vrot.lane.b32.xlu1 %v3421_v34, %s4761_s23  ;;  %v4477_v55 = vpop.f32.mrb[97].mxu1  ;;  %s432_s23 = scalar_lea.vmem [#allocation2], %s431_s16 }
 0xfc0   : > { %v3424_v21 = vpop.f32.mrb[98].mxu1  ;;  %s3769_s24 = sshll.u32 %s432_s23, 4  ;;  %s5637_s24 = int_to_ptr.vmem [resolvable:$true] %s3769_s24 }
 0xfc1   : > { %v4478_v22 = vpop.f32.mrb[99].mxu1  ;;  %s4690_s29 = scalar_lea.vmem %s5637_s24, 16  ;;  %p4697_p0 = scmp.lt.s32.totalorder %s5637_s24, %s4695_s20 }
 0xfc2   : > { %p4691_p11 = scmp.ne.s32.totalorder %s5637_s24, %s4690_s29  ;;  %p4698_p1 = scmp.lt.s32.totalorder %s4696_s21, %s4690_s29 }
 0xfc4   : > { %p4692_p12 = pnand %p4691_p11, %p4871_p5  ;;  %p4699_p2 = por %p4698_p1, %p4697_p0 }
 0xfc6   : > { %p4693_p13 = pneg %p4692_p12 }
 0xfc8   : > { %p4700_p3 = pnand %p4699_p2, %p4693_p13 }
0x1021   : > { %v3433_v24 = vpop.permute.xlu0 %3432 }
0x1029   : > { %v3429_v7 = vpop.permute.xlu1 %3428 }
0x102a   : > { %v3439_v23 = vsel %vm1459_vm3, %v3283_v36, %v3429_v7 }
0x102b   : > { %v3440_v0 = vsel %vm1898_vm6, %v3439_v23, %v3433_v24 }
0x1031   : > { %v3437_v16 = vpop.permute.xlu1 %3436 }
0x1032   : > { %v3441_v25 = vsel %vm1900_vm7, %v3440_v0, %v3437_v16 }
0x1033   : > { %v3442_v35 = vpack.c.bf16 %v3441_v25, %v3441_v25 }
0x1035   : > { %4484 = vmatmul.mubr.msk.bf16.vlgmr.msra.gmra.mrb[76].mxu0 %vm659_vm1, %v3442_v35 }
0x1036   : > { %4503 = vmatprep.mubr.msk.bf16.mxu0 %vm4756_vm2, %v4755_v30  ;;  %4496 = vmatpush3.bf16.msra.mxu0 %v4638_v54 }
0x1037   : > { %4497 = vmatprep.subr.bf16.mxu0 %v4755_v30 }
0x103a   : > { %4498 = vmatpush3.bf16.msra.mxu0 %v4639_v10 }
0x103b   : > { %4499 = vmatprep.subr.bf16.mxu0 %v4755_v30 }
0x103e   : > { %4500 = vmatpush3.bf16.msra.mxu0 %v4640_v11 }
0x103f   : > { %4501 = vmatprep.subr.bf16.mxu0 %v4755_v30 }
0x1042   : > { %4502 = vmatpush3.bf16.msra.mxu0 %v4641_v56 }
0x1108   : > { %v3496_v6 = vpop.f32.mrb[76].mxu0 }
0x1109   : > { %v3497_v26 = vadd.f32 %v3496_v6, %v3446_v9  ;;  %v4485_v27 = vpop.f32.mrb[77].mxu0 }
0x110a   : > { %v3499_v28 = vpop.f32.mrb[78].mxu0 }
0x110b   : > { %v5566_v29 = vadd.f32 %v3497_v26, %v5287_v50  ;;  %v4486_v32 = vpop.f32.mrb[79].mxu0  ;;  %v4637_v50 = vld [vmem:[%s5683_s6 + $0x18] sm:$0xff]   ;;  %v3670_v26 = vld [vmem:[%s5687_s10] sm:$0x3] }
0x110c   : > { %4490 = vmatpush3.bf16.msra.mxu1 %v4637_v50  ;;  %v3687_v27 = vrot.slane %v3670_v26, %v4958_v38  ;;  %v3692_v32 = vrot.slane %v3670_v26, %v4966_v40 }
0x110d   : > { %v3503_v17 = vsel %vm659_vm1, %v5566_v29, 0.0  ;;  %4507 = vmatprep.subr.bf16.mxu1 %v4755_v30 }
0x110e   : > { %3504 = vadd.xlane.f32.xlu1 %v3503_v17 }
0x119b   : > { %v3505_v33 = vpop.xlane.xlu1 %3504 }
0x119c   : > { %v3506_v14 = vmul.f32 0.03125, %v3505_v33 }
0x119e   : > { %v3507_v41 = vsub.f32 %v5566_v29, %v3506_v14 }
0x11a0   : > { %v3508_v42 = vmul.f32 %v3507_v41, %v3507_v41 }
0x11a2   : > { %v3509_v20 = vsel %vm659_vm1, %v3508_v42, 0.0 }
0x11a3   : > { %3510 = vadd.xlane.f32.xlu0 %v3509_v20 }
0x1230   : > { %v3511_v43 = vpop.xlane.xlu0 %3510 }
0x1231   : > { %v3512_v45 = vmul.f32 0.03125, %v3511_v43 }
0x1233   : > { %v3513_v46 = vadd.f32 1e-06, %v3512_v45 }
0x1235   : > { %4684 = vrsqrt.f32 %v3513_v46 }
0x123f   : > { %v4685_v19 = vpop.eup %4684 }
0x1240   : > { %v3515_v31 = vmul.f32 %v4685_v19, %v3507_v41 }
0x1242   : > { %v3520_v4 = vmul.f32 %v3519_v48, %v3515_v31 }
0x1244   : > { %v3525_v51 = vadd.f32 %v3524_v49, %v3520_v4 }
0x1246   : > { %v3526_v52 = vpack.c.bf16 %v3525_v51, %v3525_v51 }
0x1248   : > { %4492 = vmatmul.mubr.msk.bf16.vlgmr.msra.gmra.mrb[100].mxu1 %vm659_vm1, %v3526_v52 }
0x1249   : > { %4511 = vmatprep.mubr.msk.bf16.mxu1 %vm4756_vm2, %v4755_v30  ;;  %4508 = vmatpush3.bf16.msra.mxu1 %v4642_v37 }
0x124a   : > { %4509 = vmatprep.subr.bf16.mxu1 %v4755_v30  ;;  %v3699_v30 = vld [vmem:[%s5689_s12] sm:$0x1] }
0x124d   : > { %4510 = vmatpush3.bf16.msra.mxu1 %v4643_v15 }
0x131b   : > { %v3582_v44 = vpop.f32.mrb[100].mxu1 }
0x131c   : > { %v3583_v58 = vadd.f32 %v4018_v57, %v3582_v44  ;;  %v4493_v39 = vpop.f32.mrb[101].mxu1 }
0x131d   : > { %v3585_v36 = vpop.f32.mrb[102].mxu1 }
0x131e   : > { %v3589_v59 = vmul.f32 0.044715, %v3583_v58  ;;  %v4494_v60 = vpop.f32.mrb[103].mxu1  ;;  %v3588_v3 = vmul.f32 0.5, %v3583_v58 }
0x1320   : > { %v3590_v61 = vmul.f32 %v3589_v59, %v3583_v58 }
0x1322   : > { %v3591_v47 = vmul.f32 %v3590_v61, %v3583_v58 }
0x1324   : > { %v3592_v62 = vadd.f32 %v3591_v47, %v3583_v58 }
0x1326   : > { %v3593_v63 = vmul.f32 0.7978846, %v3592_v62 }
0x1328   : > { %4686 = vtanh.f32 %v3593_v63 }
0x1332   : > { %v4687_v2 = vpop.eup %4686 }
0x1333   : > { %v3595_v18 = vadd.f32 1.0, %v4687_v2 }
0x1335   : > { %v3596_v5 = vmul.f32 %v3595_v18, %v3588_v3 }
0x1337   : > { %v3597_v12 = vpack.c.bf16 %v3596_v5, %v3596_v5 }
0x1339   : > { %4504 = vmatmul.mubr.msk.bf16.vlgmr.msra.gmra.mrb[80].mxu0 %vm543_vm0, %v3597_v12 }
0x140c   : > { %v3663_v13 = vpop.f32.mrb[80].mxu0 }
0x140d   : > { %v3664_v34 = vadd.f32 %v3663_v13, %v3601_v8  ;;  %v4505_v55 = vpop.f32.mrb[81].mxu0 }
0x140e   : > { %v3666_v21 = vpop.f32.mrb[82].mxu0 }
0x140f   : > { %v4506_v22 = vpop.f32.mrb[83].mxu0  ;;  %v3669_v7 = vadd.f32 %v3664_v34, %v5566_v29 }
0x1411   : > { %v3671_v23 = vsel %vm659_vm1, %v3669_v7, 0.0 }
0x1412   : > { %3672 = vadd.xlane.f32.xlu0 %v3671_v23 }
0x149f   : > { %v3673_v24 = vpop.xlane.xlu0 %3672 }
0x14a0   : > { %v3674_v0 = vmul.f32 0.03125, %v3673_v24 }
0x14a2   : > { %v3675_v16 = vsub.f32 %v3669_v7, %v3674_v0 }
0x14a4   : > { %v3676_v25 = vmul.f32 %v3675_v16, %v3675_v16 }
0x14a6   : > { %v3677_v35 = vsel %vm659_vm1, %v3676_v25, 0.0 }
0x14a7   : > { %3678 = vadd.xlane.f32.xlu1 %v3677_v35 }
0x1534   : > { %v3679_v1 = vpop.xlane.xlu1 %3678 }
0x1535   : > { %v3680_v9 = vmul.f32 0.03125, %v3679_v1 }
0x1537   : > { %v3681_v6 = vadd.f32 1e-06, %v3680_v9 }
0x1539   : > { %4688 = vrsqrt.f32 %v3681_v6 }
0x1543   : > { %v4689_v28 = vpop.eup %4688 }
0x1544   : > { %v3683_v29 = vmul.f32 %v4689_v28, %v3675_v16 }
0x1546   : > { %v3688_v17 = vmul.f32 %v3687_v27, %v3683_v29 }
0x1548   : > { %v3693_v33 = vadd.f32 %v3692_v32, %v3688_v17 }
0x154a   : > { %v3694_v14 = vpack.c.bf16 %v3693_v33, %v3693_v33 }
0x154c   : > { %4512 = vmatmul.mubr.msk.bf16.vlgmr.msra.gmra.mrb[104].mxu1 %vm659_vm1, %v3694_v14 }
0x161f   : > { %v3749_v41 = vpop.f32.mrb[104].mxu1 }
0x1620   : > { %v3750_v38 = vadd.f32 %v3749_v41, %v3699_v30  ;;  %v4513_v42 = vpop.f32.mrb[105].mxu1 }
0x1621   : > { %v3752_v40 = vpop.f32.mrb[106].mxu1 }
0x1622   : > { %3755 = vst [vmem:[%s432_s23] sm:$0x1] %v3750_v38  ;;  %v4514_v20 = vpop.f32.mrb[107].mxu1 }
0x1623   : > { %4703 = shalt.err (!%p4700_p3)
}
0x1624   : > { %s4704_s16 = scalar_lea.hbm %s5635_s14, 16  ;;  %s4708_s30 = scalar_lea.hbm %s5690_s13, 32 }
0x1625   : > { %p4705_p4 = scmp.ne.s32.totalorder %s5635_s14, %s4704_s16  ;;  %p4709_p9 = scmp.lt.u32.totalorder %s5635_s14, %s5690_s13 }
0x1626   : > { %p4710_p10 = scmp.lt.u32.totalorder %s4708_s30, %s4704_s16  ;;  %p4712_p12 = scmp.lt.u32.totalorder %s4704_s16, %s5635_s14 }
0x1627   : > { %p4706_p7 = pnand %p4705_p4, %p4871_p5 }
0x1628   : > { %p4711_p11 = por %p4710_p10, %p4709_p9 }
0x1629   : > { %p4707_p8 = pneg %p4706_p7 }
0x162a   : > { %p4713_p13 = por %p4712_p12, %p4711_p11 }
0x162c   : > { %p4714_p0 = pnand %p4713_p13, %p4707_p8 }
0x162e   : > { %4717 = shalt.err (!%p4714_p0)
}
0x162f   : > { %4515 = dma.vmem_to_hbm [thread:$0]  (%p4871_p5), %s5637_s24, 16, %s5635_s14, %s3757_s15  }
0x1630 PF: > { %p4521_p1 = scmp.ge.s32.totalorder %s4752_s28, 2  ;;  %s3781_s29 = sand.u32 1, %s4740_s25  }
0x1631   : > { %s3782_s20 = scalar_lea.sflag [#allocation3], %s3781_s29 }
0x1632   : > { %p4518_p2 = pnand %p4521_p1, %p4875_p6 }
0x1634   : > { %4735 = dma.done.wait (!%p4518_p2), %s3782_s20, 16  }
0x1635   : > { %4737 = vsyncadd (!%p4518_p2), %s3782_s20, 4294967280  ;;  %s5699_s28 = sld [smem:[#allocation6_spill]]  ;;  %s5700_s21 = sld [smem:[#allocation5_spill]] }
0x1636   : > { %s5701_s27 = sld [smem:[#allocation7_spill]]  ;;  %s5702_s25 = smov %s4744_s26 }
0x163b   : > { %p23_p3 = scmp.ge.s32.totalorder %s5699_s28, 4   ;;  %s5703_s26 = smov %s5700_s21 }
0x163d   :  { %25 = sbr.rel (!%p23_p3) target bundleno = 3 (0x3), region = 114 }
0x1644   :  { %3786 = vsyncpa [#allocation3], 1 }
0x1645   :  { %3788 = vsyncpa [#allocation3 + $0x1], 1 }

</bundles_post_ra>
